<compile_context>
chip_gen: v7x
topology: tpu7x:2x2x1
jax: 0.10.0
libtpu: 0.0.40
codegen_flags: <defaults>
</compile_context>

<pallas_src>
import functools
import math
import numpy as np

import jax
import jax.numpy as jnp
from jax.experimental import pallas as pl
from jax.experimental.pallas import tpu as pltpu

# ---- small, module-consistent shapes -------------------------------------
INPUT_DIM = 3        # module default input_dim=3
FEAT_DIM = 32        # stand-in for feat_dim=250 (kept small)
NHEADS = 4           # stand-in for nheads=10 (must divide FEAT_DIM)
HEAD_DIM = FEAT_DIM // NHEADS
DIM_FF = 64          # stand-in for the nn.TransformerEncoderLayer default 2048
SEQ = 8
BATCH = 2
LN_EPS = 1e-5        # PyTorch LayerNorm default

assert FEAT_DIM % 2 == 0, "positional encoding assumes an even feat_dim"
assert FEAT_DIM % NHEADS == 0

# ---- lane-padded kernel shapes --------------------------------------------
LANE = 128
D_PAD = 128          # FEAT_DIM  -> 128 (lane-dense feature dim)
FF_PAD = 128         # DIM_FF    -> 128
DIN_PAD = 8          # INPUT_DIM -> 8 (sublane-aligned; contraction dim only)


@functools.lru_cache(maxsize=None)
def _positional_encoding_np(seq_len, feat_dim):
    """PE table built once per (S, D) and cached."""
    position = np.arange(seq_len, dtype=np.float32)[:, None]
    div_term = np.exp(np.arange(0, feat_dim, 2, dtype=np.float32)
                      * (-math.log(10000.0) / feat_dim))
    pe = np.zeros((seq_len, feat_dim), np.float32)
    pe[:, 0::2] = np.sin(position * div_term)
    pe[:, 1::2] = np.cos(position * div_term)
    return pe


# ---------------------------------------------------------------------------
# Pallas kernel: the entire (batch-folded) encoder in a single grid step.
# ---------------------------------------------------------------------------
def _make_kernel(batch, seq, nheads, d_real, head_dim):
    scale = 1.0 / math.sqrt(head_dim)
    inv_d = 1.0 / d_real
    rows = batch * seq

    def kernel(x_ref, pebe_ref, mask_ref,
               we_t_ref, wqkv_ref, bqkv_ref, wo_ref, bo_ref,
               g1_ref, bt1_ref, w1_t_ref, b1_ref, w2_t_ref, b2_ref,
               g2_ref, bt2_ref, wd_t_ref, bd_ref,
               out_ref):
        f32 = jnp.float32
        bf16 = jnp.bfloat16
        mask = mask_ref[...]                                   # (1, D_PAD)

        def layer_norm(t, g, b):
            # masked LN over the first `d_real` lanes; padding lanes of t are 0.
            mu = jnp.sum(t, axis=-1, keepdims=True) * inv_d
            tc = (t - mu) * mask
            var = jnp.sum(tc * tc, axis=-1, keepdims=True) * inv_d
            return tc * jax.lax.rsqrt(var + LN_EPS) * g + b

        # ---- input embedding + positional encoding (embedding bias folded
        #      into the PE slab; PE broadcast over batch in-kernel) ----------
        h = jnp.dot(x_ref[...].astype(bf16), we_t_ref[...],
                    preferred_element_type=f32)                         # (rows, D_PAD)
        h = (h.reshape(batch, seq, D_PAD)
             + pebe_ref[...][None]).reshape(rows, D_PAD)
        h_bf = h.astype(bf16)

        # ---- fused QKV: one 2-D matmul with a single shared weight ---------
        qkv = jnp.dot(h_bf, wqkv_ref[...],
                      preferred_element_type=f32) + bqkv_ref[...]       # (rows, 3*D_PAD)
        q3 = qkv[:, 0:D_PAD].reshape(batch, seq, D_PAD)
        k3 = qkv[:, D_PAD:2 * D_PAD].reshape(batch, seq, D_PAD)
        v3 = qkv[:, 2 * D_PAD:3 * D_PAD].reshape(batch, seq, D_PAD)

        # ---- per-head views over the REAL head_dim (no pad to 128) ---------
        def heads(t3):
            return jnp.concatenate(
                [t3[:, :, hh * head_dim:(hh + 1) * head_dim]
                 for hh in range(nheads)], axis=0)                       # (H*B, S, hd)

        q_n, k_n, v_n = heads(q3), heads(k3), heads(v3)

        # ---- scaled dot-product attention (f32; tiny contractions) ---------
        s = jnp.einsum('nqd,nkd->nqk', q_n, k_n,
                       preferred_element_type=f32) * scale              # (H*B, S, S)
        s = s - jnp.max(s, axis=-1, keepdims=True)
        p = jnp.exp(s)
        p = p * pl.reciprocal(jnp.sum(p, axis=-1, keepdims=True), approx=True)
        attn = jnp.einsum('nqk,nkd->nqd', p, v_n,
                          preferred_element_type=f32)                   # (H*B, S, hd)

        # ---- re-pack heads along lanes -> ONE 2-D output projection --------
        attn_packed = jnp.concatenate(
            [attn[hh * batch:(hh + 1) * batch].reshape(rows, head_dim)
             for hh in range(nheads)], axis=-1)                         # (rows, H*hd)
        o = jnp.dot(attn_packed.astype(bf16), wo_ref[...],
                    preferred_element_type=f32) + bo_ref[...]           # (rows, D_PAD)

        # ---- residual + LayerNorm 1 (post-norm) -----------------------------
        y = layer_norm(h + o, g1_ref[...], bt1_ref[...])
        y_bf = y.astype(bf16)

        # ---- feed-forward (Linear -> ReLU -> Linear) ------------------------
        f = jnp.dot(y_bf, w1_t_ref[...],
                    preferred_element_type=f32) + b1_ref[...]
        f = jnp.maximum(f, 0.0)
        f = jnp.dot(f.astype(bf16), w2_t_ref[...],
                    preferred_element_type=f32) + b2_ref[...]

        # ---- residual + LayerNorm 2 -----------------------------------------
        z = layer_norm(y + f, g2_ref[...], bt2_ref[...])

        # ---- decoder + sigmoid (lane-dense padded output; column 0 is real) -
        o_dec = jnp.dot(z.astype(bf16), wd_t_ref[...],
                        preferred_element_type=f32) + bd_ref[...]
        out_ref[...] = jax.nn.sigmoid(o_dec)                            # (rows, 128)

    return kernel


# ---------------------------------------------------------------------------
# One-time weight packing (pad / transpose / bf16) — OUTSIDE the jitted forward.
# ---------------------------------------------------------------------------
def _pad2(a, rows, cols):
    return jnp.pad(a, ((0, rows - a.shape[0]), (0, cols - a.shape[1])))


def _row(v, n):
    v = jnp.asarray(v).reshape(1, -1)
    return jnp.pad(v, ((0, 0), (0, n - v.shape[1])))


def pack_params(params, seq_len):
    """Pack weights lane-dense once; the jitted forward only pads activations."""
    pe = jnp.asarray(_positional_encoding_np(seq_len, FEAT_DIM))
    pe_be = _pad2(pe, seq_len, D_PAD) + _row(params["be"], D_PAD)        # (S, 128)
    mask = (jnp.arange(D_PAD) < FEAT_DIM).astype(jnp.float32).reshape(1, D_PAD)

    we_t = _pad2(params["we"].T, DIN_PAD, D_PAD).astype(jnp.bfloat16)    # (8, 128)

    wqkv_t = jnp.concatenate(
        [_pad2(params[w].T, D_PAD, D_PAD) for w in ("wq", "wk", "wv")],
        axis=1).astype(jnp.bfloat16)                                     # (128, 384)
    bqkv = jnp.concatenate(
        [_row(params[b], D_PAD) for b in ("bq", "bk", "bv")], axis=1)    # (1, 384)

    wo_t = _pad2(params["wo"].T, FEAT_DIM, D_PAD).astype(jnp.bfloat16)   # (32, 128)
    bo = _row(params["bo"], D_PAD)

    g1 = _row(params["g1"], D_PAD)
    bt1 = _row(params["bt1"], D_PAD)
    w1_t = _pad2(params["w1"].T, D_PAD, FF_PAD).astype(jnp.bfloat16)     # (128, 128)
    b1 = _row(params["b1"], FF_PAD)
    w2_t = _pad2(params["w2"].T, FF_PAD, D_PAD).astype(jnp.bfloat16)     # (128, 128)
    b2 = _row(params["b2"], D_PAD)
    g2 = _row(params["g2"], D_PAD)
    bt2 = _row(params["bt2"], D_PAD)
    wd_t = _pad2(params["wd"].T, D_PAD, LANE).astype(jnp.bfloat16)       # col 0 real
    bd = _row(params["bd"], LANE)

    return (pe_be, mask, we_t, wqkv_t, bqkv, wo_t, bo,
            g1, bt1, w1_t, b1, w2_t, b2, g2, bt2, wd_t, bd)


# ---------------------------------------------------------------------------
# Jitted forward: pad the activation, call the kernel once, slice the output.
# ---------------------------------------------------------------------------
@jax.jit
def transformer_forward_pallas(x, packed):
    B, S, Din = x.shape
    x_flat = jnp.pad(x.reshape(B * S, Din), ((0, 0), (0, DIN_PAD - Din)))  # (B*S, 8)
    inputs = (x_flat,) + tuple(packed)

    kernel = _make_kernel(B, S, NHEADS, FEAT_DIM, HEAD_DIM)

    def full_spec(a):
        return pl.BlockSpec(a.shape, lambda i, n=a.ndim: (0,) * n)

    out_pad = pl.pallas_call(
        kernel,
        out_shape=jax.ShapeDtypeStruct((B * S, D_PAD), jnp.float32),
        grid=(1,),                                   # whole batch fused: one grid step
        in_specs=[full_spec(a) for a in inputs],
        out_specs=pl.BlockSpec((B * S, D_PAD), lambda i: (0, 0)),
        compiler_params=pltpu.CompilerParams(dimension_semantics=("arbitrary",)),
    )(*inputs)

    # lane-dense kernel output; the real decoder column is column 0.
    return out_pad[:, :1].reshape(B, S, 1)


# ---------------------------------------------------------------------------
# Pure-JAX reference (same math, unpadded f32) for validation.
# ---------------------------------------------------------------------------
def reference_forward(x, params):
    B, S, _ = x.shape
    D = FEAT_DIM
    pe = jnp.asarray(_positional_encoding_np(S, D))
    h = x @ params["we"].T + params["be"] + pe

    def proj(w, b):
        return (h @ w.T + b).reshape(B, S, NHEADS, HEAD_DIM).transpose(0, 2, 1, 3)

    q = proj(params["wq"], params["bq"]) / math.sqrt(HEAD_DIM)
    k = proj(params["wk"], params["bk"])
    v = proj(params["wv"], params["bv"])
    s = jnp.einsum("bhqd,bhkd->bhqk", q, k)
    p = jax.nn.softmax(s, axis=-1)
    a = jnp.einsum("bhqk,bhkd->bhqd", p, v).transpose(0, 2, 1, 3).reshape(B, S, D)
    a = a @ params["wo"].T + params["bo"]

    def ln(t, g, bt):
        mu = jnp.mean(t, -1, keepdims=True)
        var = jnp.mean(jnp.square(t - mu), -1, keepdims=True)
        return (t - mu) * jax.lax.rsqrt(var + LN_EPS) * g + bt

    y = ln(h + a, params["g1"], params["bt1"])
    f = jnp.maximum(y @ params["w1"].T + params["b1"], 0.0) @ params["w2"].T + params["b2"]
    z = ln(y + f, params["g2"], params["bt2"])
    return jax.nn.sigmoid(z @ params["wd"].T + params["bd"])


# ---------------------------------------------------------------------------
# Deterministic parameter init (shapes from the module's __init__).
# ---------------------------------------------------------------------------
def init_params(key):
    ks = jax.random.split(key, 8)

    def lin(k, out_dim, in_dim):
        bound = 1.0 / math.sqrt(in_dim)
        kw, kb = jax.random.split(k)
        w = jax.random.uniform(kw, (out_dim, in_dim), jnp.float32, -bound, bound)
        b = jax.random.uniform(kb, (out_dim,), jnp.float32, -bound, bound)
        return w, b

    we, be = lin(ks[0], FEAT_DIM, INPUT_DIM)          # input_embedding
    wq, bq = lin(ks[1], FEAT_DIM, FEAT_DIM)           # in_proj (q/k/v)
    wk, bk = lin(ks[2], FEAT_DIM, FEAT_DIM)
    wv, bv = lin(ks[3], FEAT_DIM, FEAT_DIM)
    wo, bo = lin(ks[4], FEAT_DIM, FEAT_DIM)           # attn out_proj
    w1, b1 = lin(ks[5], DIM_FF, FEAT_DIM)             # FFN linear1
    w2, b2 = lin(ks[6], FEAT_DIM, DIM_FF)             # FFN linear2
    wd = jax.random.uniform(ks[7], (1, FEAT_DIM), jnp.float32, -0.1, 0.1)  # decoder
    bd = jnp.zeros((1,), jnp.float32)                 # decoder bias zeroed (init_weights)
    return dict(
        we=we, be=be, wq=wq, bq=bq, wk=wk, bk=bk, wv=wv, bv=bv, wo=wo, bo=bo,
        g1=jnp.ones((FEAT_DIM,), jnp.float32), bt1=jnp.zeros((FEAT_DIM,), jnp.float32),
        w1=w1, b1=b1, w2=w2, b2=b2,
        g2=jnp.ones((FEAT_DIM,), jnp.float32), bt2=jnp.zeros((FEAT_DIM,), jnp.float32),
        wd=wd, bd=bd,
    )


if __name__ == "__main__":
    key = jax.random.PRNGKey(0)
    k_param, k_x = jax.random.split(key)
    params = init_params(k_param)
    x = jax.random.normal(k_x, (BATCH, SEQ, INPUT_DIM), jnp.float32)

    packed = pack_params(params, SEQ)                 # one-time weight packing

    out = jax.block_until_ready(transformer_forward_pallas(x, packed))
    ref = jax.block_until_ready(reference_forward(x, params))

    assert out.shape == (BATCH, SEQ, 1)
    # bf16 MXU operands (f32 accumulation) + approx softmax reciprocal vs
    # pure-f32 reference -> 2e-2 tolerance.
    np.testing.assert_allclose(np.asarray(out), np.asarray(ref), rtol=2e-2, atol=2e-2)
    print("KERNEL_OK")
</pallas_src>

<mosaic_0001>
module attributes {stable_mosaic.version = 11 : i64} {
  func.func @kernel(%arg0: i32, %arg1: memref<16x8xf32, #tpu.memory_space<vmem>>, %arg2: memref<8x128xf32, #tpu.memory_space<vmem>>, %arg3: memref<1x128xf32, #tpu.memory_space<vmem>>, %arg4: memref<8x128xbf16, #tpu.memory_space<vmem>>, %arg5: memref<128x384xbf16, #tpu.memory_space<vmem>>, %arg6: memref<1x384xf32, #tpu.memory_space<vmem>>, %arg7: memref<32x128xbf16, #tpu.memory_space<vmem>>, %arg8: memref<1x128xf32, #tpu.memory_space<vmem>>, %arg9: memref<1x128xf32, #tpu.memory_space<vmem>>, %arg10: memref<1x128xf32, #tpu.memory_space<vmem>>, %arg11: memref<128x128xbf16, #tpu.memory_space<vmem>>, %arg12: memref<1x128xf32, #tpu.memory_space<vmem>>, %arg13: memref<128x128xbf16, #tpu.memory_space<vmem>>, %arg14: memref<1x128xf32, #tpu.memory_space<vmem>>, %arg15: memref<1x128xf32, #tpu.memory_space<vmem>>, %arg16: memref<1x128xf32, #tpu.memory_space<vmem>>, %arg17: memref<128x128xbf16, #tpu.memory_space<vmem>>, %arg18: memref<1x128xf32, #tpu.memory_space<vmem>>, %arg19: memref<16x128xf32, #tpu.memory_space<vmem>>) attributes {dimension_semantics = [#tpu.dimension_semantics<arbitrary>], iteration_bounds = array<i64: 1>, scalar_prefetch = 0 : i64, scratch_operands = 0 : i64, tpu.core_type = #tpu.core_type<tc>, window_params = [{pipeline_mode = #tpu.pipeline_mode<synchronous>, transform_indices = @transform_0, window_bounds = array<i64: 16, 8>}, {pipeline_mode = #tpu.pipeline_mode<synchronous>, transform_indices = @transform_1, window_bounds = array<i64: 8, 128>}, {pipeline_mode = #tpu.pipeline_mode<synchronous>, transform_indices = @transform_2, window_bounds = array<i64: 1, 128>}, {pipeline_mode = #tpu.pipeline_mode<synchronous>, transform_indices = @transform_3, window_bounds = array<i64: 8, 128>}, {pipeline_mode = #tpu.pipeline_mode<synchronous>, transform_indices = @transform_4, window_bounds = array<i64: 128, 384>}, {pipeline_mode = #tpu.pipeline_mode<synchronous>, transform_indices = @transform_5, window_bounds = array<i64: 1, 384>}, {pipeline_mode = #tpu.pipeline_mode<synchronous>, transform_indices = @transform_6, window_bounds = array<i64: 32, 128>}, {pipeline_mode = #tpu.pipeline_mode<synchronous>, transform_indices = @transform_7, window_bounds = array<i64: 1, 128>}, {pipeline_mode = #tpu.pipeline_mode<synchronous>, transform_indices = @transform_8, window_bounds = array<i64: 1, 128>}, {pipeline_mode = #tpu.pipeline_mode<synchronous>, transform_indices = @transform_9, window_bounds = array<i64: 1, 128>}, {pipeline_mode = #tpu.pipeline_mode<synchronous>, transform_indices = @transform_10, window_bounds = array<i64: 128, 128>}, {pipeline_mode = #tpu.pipeline_mode<synchronous>, transform_indices = @transform_11, window_bounds = array<i64: 1, 128>}, {pipeline_mode = #tpu.pipeline_mode<synchronous>, transform_indices = @transform_12, window_bounds = array<i64: 128, 128>}, {pipeline_mode = #tpu.pipeline_mode<synchronous>, transform_indices = @transform_13, window_bounds = array<i64: 1, 128>}, {pipeline_mode = #tpu.pipeline_mode<synchronous>, transform_indices = @transform_14, window_bounds = array<i64: 1, 128>}, {pipeline_mode = #tpu.pipeline_mode<synchronous>, transform_indices = @transform_15, window_bounds = array<i64: 1, 128>}, {pipeline_mode = #tpu.pipeline_mode<synchronous>, transform_indices = @transform_16, window_bounds = array<i64: 128, 128>}, {pipeline_mode = #tpu.pipeline_mode<synchronous>, transform_indices = @transform_17, window_bounds = array<i64: 1, 128>}, {pipeline_mode = #tpu.pipeline_mode<synchronous>, transform_indices = @transform_18, window_bounds = array<i64: 16, 128>}]} {
    %c0 = arith.constant 0 : index
    %c0_0 = arith.constant 0 : index
    %0 = vector.load %arg3[%c0, %c0_0] : memref<1x128xf32, #tpu.memory_space<vmem>>, vector<1x128xf32>
    %c0_1 = arith.constant 0 : index
    %c0_2 = arith.constant 0 : index
    %1 = vector.load %arg1[%c0_1, %c0_2] : memref<16x8xf32, #tpu.memory_space<vmem>>, vector<16x8xf32>
    %2 = arith.truncf %1 : vector<16x8xf32> to vector<16x8xbf16>
    %c0_3 = arith.constant 0 : index
    %c0_4 = arith.constant 0 : index
    %3 = vector.load %arg4[%c0_3, %c0_4] : memref<8x128xbf16, #tpu.memory_space<vmem>>, vector<8x128xbf16>
    %cst = arith.constant dense<0.000000e+00> : vector<16x128xf32>
    %4 = tpu.matmul %2, %3, %cst {dimension_numbers = #tpu.dot_dimension_numbers<[1], [0], [0], [1], [0, 0, 1, 1], [], []>} : vector<16x8xbf16>, vector<8x128xbf16>, vector<16x128xf32> -> vector<16x128xf32>
    %5 = vector.shape_cast %4 : vector<16x128xf32> to vector<2x8x128xf32>
    %c0_5 = arith.constant 0 : index
    %c0_6 = arith.constant 0 : index
    %6 = vector.load %arg2[%c0_5, %c0_6] : memref<8x128xf32, #tpu.memory_space<vmem>>, vector<8x128xf32>
    %7 = vector.shape_cast %6 : vector<8x128xf32> to vector<1x8x128xf32>
    %8 = vector.broadcast %7 : vector<1x8x128xf32> to vector<2x8x128xf32>
    %9 = arith.addf %5, %8 : vector<2x8x128xf32>
    %10 = vector.shape_cast %9 : vector<2x8x128xf32> to vector<16x128xf32>
    %11 = arith.truncf %10 : vector<16x128xf32> to vector<16x128xbf16>
    %c0_7 = arith.constant 0 : index
    %c0_8 = arith.constant 0 : index
    %12 = vector.load %arg5[%c0_7, %c0_8] : memref<128x384xbf16, #tpu.memory_space<vmem>>, vector<128x384xbf16>
    %cst_9 = arith.constant dense<0.000000e+00> : vector<16x384xf32>
    %13 = tpu.matmul %11, %12, %cst_9 {dimension_numbers = #tpu.dot_dimension_numbers<[1], [0], [0], [1], [0, 0, 1, 1], [], []>} : vector<16x128xbf16>, vector<128x384xbf16>, vector<16x384xf32> -> vector<16x384xf32>
    %c0_10 = arith.constant 0 : index
    %c0_11 = arith.constant 0 : index
    %14 = vector.load %arg6[%c0_10, %c0_11] : memref<1x384xf32, #tpu.memory_space<vmem>>, vector<1x384xf32>
    %15 = vector.broadcast %14 : vector<1x384xf32> to vector<16x384xf32>
    %16 = arith.addf %13, %15 : vector<16x384xf32>
    %17 = vector.extract_strided_slice %16 {offsets = [0, 0], sizes = [16, 128], strides = [1, 1]} : vector<16x384xf32> to vector<16x128xf32>
    %18 = vector.shape_cast %17 : vector<16x128xf32> to vector<2x8x128xf32>
    %19 = vector.extract_strided_slice %16 {offsets = [0, 128], sizes = [16, 128], strides = [1, 1]} : vector<16x384xf32> to vector<16x128xf32>
    %20 = vector.shape_cast %19 : vector<16x128xf32> to vector<2x8x128xf32>
    %21 = vector.extract_strided_slice %16 {offsets = [0, 256], sizes = [16, 128], strides = [1, 1]} : vector<16x384xf32> to vector<16x128xf32>
    %22 = vector.shape_cast %21 : vector<16x128xf32> to vector<2x8x128xf32>
    %23 = vector.extract_strided_slice %18 {offsets = [0, 0, 0], sizes = [2, 8, 8], strides = [1, 1, 1]} : vector<2x8x128xf32> to vector<2x8x8xf32>
    %24 = vector.extract_strided_slice %18 {offsets = [0, 0, 8], sizes = [2, 8, 8], strides = [1, 1, 1]} : vector<2x8x128xf32> to vector<2x8x8xf32>
    %25 = vector.extract_strided_slice %18 {offsets = [0, 0, 16], sizes = [2, 8, 8], strides = [1, 1, 1]} : vector<2x8x128xf32> to vector<2x8x8xf32>
    %26 = vector.extract_strided_slice %18 {offsets = [0, 0, 24], sizes = [2, 8, 8], strides = [1, 1, 1]} : vector<2x8x128xf32> to vector<2x8x8xf32>
    %27 = tpu.concatenate %23, %24, %25, %26 in 0 : vector<2x8x8xf32>, vector<2x8x8xf32>, vector<2x8x8xf32>, vector<2x8x8xf32> -> vector<8x8x8xf32>
    %28 = vector.extract_strided_slice %20 {offsets = [0, 0, 0], sizes = [2, 8, 8], strides = [1, 1, 1]} : vector<2x8x128xf32> to vector<2x8x8xf32>
    %29 = vector.extract_strided_slice %20 {offsets = [0, 0, 8], sizes = [2, 8, 8], strides = [1, 1, 1]} : vector<2x8x128xf32> to vector<2x8x8xf32>
    %30 = vector.extract_strided_slice %20 {offsets = [0, 0, 16], sizes = [2, 8, 8], strides = [1, 1, 1]} : vector<2x8x128xf32> to vector<2x8x8xf32>
    %31 = vector.extract_strided_slice %20 {offsets = [0, 0, 24], sizes = [2, 8, 8], strides = [1, 1, 1]} : vector<2x8x128xf32> to vector<2x8x8xf32>
    %32 = tpu.concatenate %28, %29, %30, %31 in 0 : vector<2x8x8xf32>, vector<2x8x8xf32>, vector<2x8x8xf32>, vector<2x8x8xf32> -> vector<8x8x8xf32>
    %33 = vector.extract_strided_slice %22 {offsets = [0, 0, 0], sizes = [2, 8, 8], strides = [1, 1, 1]} : vector<2x8x128xf32> to vector<2x8x8xf32>
    %34 = vector.extract_strided_slice %22 {offsets = [0, 0, 8], sizes = [2, 8, 8], strides = [1, 1, 1]} : vector<2x8x128xf32> to vector<2x8x8xf32>
    %35 = vector.extract_strided_slice %22 {offsets = [0, 0, 16], sizes = [2, 8, 8], strides = [1, 1, 1]} : vector<2x8x128xf32> to vector<2x8x8xf32>
    %36 = vector.extract_strided_slice %22 {offsets = [0, 0, 24], sizes = [2, 8, 8], strides = [1, 1, 1]} : vector<2x8x128xf32> to vector<2x8x8xf32>
    %37 = tpu.concatenate %33, %34, %35, %36 in 0 : vector<2x8x8xf32>, vector<2x8x8xf32>, vector<2x8x8xf32>, vector<2x8x8xf32> -> vector<8x8x8xf32>
    "tpu.trace_start"() <{level = 10 : i32, message = "nqd,nkd->nqk"}> : () -> ()
    %cst_12 = arith.constant dense<0.000000e+00> : vector<8x8x8xf32>
    %38 = tpu.matmul %27, %32, %cst_12 {dimension_numbers = #tpu.dot_dimension_numbers<[2], [2], [1], [1], [0, 0, 0, 1, 1, 1], [0], [0]>} : vector<8x8x8xf32>, vector<8x8x8xf32>, vector<8x8x8xf32> -> vector<8x8x8xf32>
    "tpu.trace_stop"() : () -> ()
    %cst_13 = arith.constant 0.353553385 : f32
    %39 = vector.broadcast %cst_13 : f32 to vector<8x8x8xf32>
    %40 = arith.mulf %38, %39 : vector<8x8x8xf32>
    %cst_14 = arith.constant dense<0xFF800000> : vector<8x8xf32>
    %41 = vector.multi_reduction <maximumf>, %40, %cst_14 [2] : vector<8x8x8xf32> to vector<8x8xf32>
    %42 = vector.shape_cast %41 : vector<8x8xf32> to vector<8x8x1xf32>
    %43 = vector.broadcast %42 : vector<8x8x1xf32> to vector<8x8x8xf32>
    %44 = arith.subf %40, %43 : vector<8x8x8xf32>
    %45 = math.exp %44 : vector<8x8x8xf32>
    %cst_15 = arith.constant dense<0.000000e+00> : vector<8x8xf32>
    %46 = vector.multi_reduction <add>, %45, %cst_15 [2] : vector<8x8x8xf32> to vector<8x8xf32>
    %47 = vector.shape_cast %46 : vector<8x8xf32> to vector<8x8x1xf32>
    %48 = tpu.reciprocal %47 {approx = true} : vector<8x8x1xf32> -> vector<8x8x1xf32>
    %49 = vector.broadcast %48 : vector<8x8x1xf32> to vector<8x8x8xf32>
    %50 = arith.mulf %45, %49 : vector<8x8x8xf32>
    "tpu.trace_start"() <{level = 10 : i32, message = "nqk,nkd->nqd"}> : () -> ()
    %cst_16 = arith.constant dense<0.000000e+00> : vector<8x8x8xf32>
    %51 = tpu.matmul %50, %37, %cst_16 {dimension_numbers = #tpu.dot_dimension_numbers<[2], [1], [1], [2], [0, 0, 0, 1, 1, 2], [0], [0]>} : vector<8x8x8xf32>, vector<8x8x8xf32>, vector<8x8x8xf32> -> vector<8x8x8xf32>
    "tpu.trace_stop"() : () -> ()
    %52 = vector.extract_strided_slice %51 {offsets = [0, 0, 0], sizes = [2, 8, 8], strides = [1, 1, 1]} : vector<8x8x8xf32> to vector<2x8x8xf32>
    %53 = vector.shape_cast %52 : vector<2x8x8xf32> to vector<16x8xf32>
    %54 = vector.extract_strided_slice %51 {offsets = [2, 0, 0], sizes = [2, 8, 8], strides = [1, 1, 1]} : vector<8x8x8xf32> to vector<2x8x8xf32>
    %55 = vector.shape_cast %54 : vector<2x8x8xf32> to vector<16x8xf32>
    %56 = vector.extract_strided_slice %51 {offsets = [4, 0, 0], sizes = [2, 8, 8], strides = [1, 1, 1]} : vector<8x8x8xf32> to vector<2x8x8xf32>
    %57 = vector.shape_cast %56 : vector<2x8x8xf32> to vector<16x8xf32>
    %58 = vector.extract_strided_slice %51 {offsets = [6, 0, 0], sizes = [2, 8, 8], strides = [1, 1, 1]} : vector<8x8x8xf32> to vector<2x8x8xf32>
    %59 = vector.shape_cast %58 : vector<2x8x8xf32> to vector<16x8xf32>
    %60 = tpu.concatenate %53, %55, %57, %59 in 1 : vector<16x8xf32>, vector<16x8xf32>, vector<16x8xf32>, vector<16x8xf32> -> vector<16x32xf32>
    %61 = arith.truncf %60 : vector<16x32xf32> to vector<16x32xbf16>
    %c0_17 = arith.constant 0 : index
    %c0_18 = arith.constant 0 : index
    %62 = vector.load %arg7[%c0_17, %c0_18] : memref<32x128xbf16, #tpu.memory_space<vmem>>, vector<32x128xbf16>
    %cst_19 = arith.constant dense<0.000000e+00> : vector<16x128xf32>
    %63 = tpu.matmul %61, %62, %cst_19 {dimension_numbers = #tpu.dot_dimension_numbers<[1], [0], [0], [1], [0, 0, 1, 1], [], []>} : vector<16x32xbf16>, vector<32x128xbf16>, vector<16x128xf32> -> vector<16x128xf32>
    %c0_20 = arith.constant 0 : index
    %c0_21 = arith.constant 0 : index
    %64 = vector.load %arg8[%c0_20, %c0_21] : memref<1x128xf32, #tpu.memory_space<vmem>>, vector<1x128xf32>
    %65 = vector.broadcast %64 : vector<1x128xf32> to vector<16x128xf32>
    %66 = arith.addf %63, %65 : vector<16x128xf32>
    %67 = arith.addf %10, %66 : vector<16x128xf32>
    %c0_22 = arith.constant 0 : index
    %c0_23 = arith.constant 0 : index
    %68 = vector.load %arg9[%c0_22, %c0_23] : memref<1x128xf32, #tpu.memory_space<vmem>>, vector<1x128xf32>
    %c0_24 = arith.constant 0 : index
    %c0_25 = arith.constant 0 : index
    %69 = vector.load %arg10[%c0_24, %c0_25] : memref<1x128xf32, #tpu.memory_space<vmem>>, vector<1x128xf32>
    %cst_26 = arith.constant dense<0.000000e+00> : vector<16xf32>
    %70 = vector.multi_reduction <add>, %67, %cst_26 [1] : vector<16x128xf32> to vector<16xf32>
    %71 = vector.shape_cast %70 : vector<16xf32> to vector<16x1xf32>
    %cst_27 = arith.constant 3.125000e-02 : f32
    %72 = vector.broadcast %cst_27 : f32 to vector<16x1xf32>
    %73 = arith.mulf %71, %72 : vector<16x1xf32>
    %74 = vector.broadcast %73 : vector<16x1xf32> to vector<16x128xf32>
    %75 = arith.subf %67, %74 : vector<16x128xf32>
    %76 = vector.broadcast %0 : vector<1x128xf32> to vector<16x128xf32>
    %77 = arith.mulf %75, %76 : vector<16x128xf32>
    %78 = arith.mulf %77, %77 : vector<16x128xf32>
    %cst_28 = arith.constant dense<0.000000e+00> : vector<16xf32>
    %79 = vector.multi_reduction <add>, %78, %cst_28 [1] : vector<16x128xf32> to vector<16xf32>
    %80 = vector.shape_cast %79 : vector<16xf32> to vector<16x1xf32>
    %cst_29 = arith.constant 3.125000e-02 : f32
    %81 = vector.broadcast %cst_29 : f32 to vector<16x1xf32>
    %82 = arith.mulf %80, %81 : vector<16x1xf32>
    %cst_30 = arith.constant 9.99999974E-6 : f32
    %83 = vector.broadcast %cst_30 : f32 to vector<16x1xf32>
    %84 = arith.addf %82, %83 : vector<16x1xf32>
    %85 = math.rsqrt %84 : vector<16x1xf32>
    %86 = vector.broadcast %85 : vector<16x1xf32> to vector<16x128xf32>
    %87 = arith.mulf %77, %86 : vector<16x128xf32>
    %88 = vector.broadcast %68 : vector<1x128xf32> to vector<16x128xf32>
    %89 = arith.mulf %87, %88 : vector<16x128xf32>
    %90 = vector.broadcast %69 : vector<1x128xf32> to vector<16x128xf32>
    %91 = arith.addf %89, %90 : vector<16x128xf32>
    %92 = arith.truncf %91 : vector<16x128xf32> to vector<16x128xbf16>
    %c0_31 = arith.constant 0 : index
    %c0_32 = arith.constant 0 : index
    %93 = vector.load %arg11[%c0_31, %c0_32] : memref<128x128xbf16, #tpu.memory_space<vmem>>, vector<128x128xbf16>
    %cst_33 = arith.constant dense<0.000000e+00> : vector<16x128xf32>
    %94 = tpu.matmul %92, %93, %cst_33 {dimension_numbers = #tpu.dot_dimension_numbers<[1], [0], [0], [1], [0, 0, 1, 1], [], []>} : vector<16x128xbf16>, vector<128x128xbf16>, vector<16x128xf32> -> vector<16x128xf32>
    %c0_34 = arith.constant 0 : index
    %c0_35 = arith.constant 0 : index
    %95 = vector.load %arg12[%c0_34, %c0_35] : memref<1x128xf32, #tpu.memory_space<vmem>>, vector<1x128xf32>
    %96 = vector.broadcast %95 : vector<1x128xf32> to vector<16x128xf32>
    %97 = arith.addf %94, %96 : vector<16x128xf32>
    %cst_36 = arith.constant 0.000000e+00 : f32
    %98 = vector.broadcast %cst_36 : f32 to vector<16x128xf32>
    %99 = arith.maximumf %97, %98 : vector<16x128xf32>
    %100 = arith.truncf %99 : vector<16x128xf32> to vector<16x128xbf16>
    %c0_37 = arith.constant 0 : index
    %c0_38 = arith.constant 0 : index
    %101 = vector.load %arg13[%c0_37, %c0_38] : memref<128x128xbf16, #tpu.memory_space<vmem>>, vector<128x128xbf16>
    %cst_39 = arith.constant dense<0.000000e+00> : vector<16x128xf32>
    %102 = tpu.matmul %100, %101, %cst_39 {dimension_numbers = #tpu.dot_dimension_numbers<[1], [0], [0], [1], [0, 0, 1, 1], [], []>} : vector<16x128xbf16>, vector<128x128xbf16>, vector<16x128xf32> -> vector<16x128xf32>
    %c0_40 = arith.constant 0 : index
    %c0_41 = arith.constant 0 : index
    %103 = vector.load %arg14[%c0_40, %c0_41] : memref<1x128xf32, #tpu.memory_space<vmem>>, vector<1x128xf32>
    %104 = vector.broadcast %103 : vector<1x128xf32> to vector<16x128xf32>
    %105 = arith.addf %102, %104 : vector<16x128xf32>
    %106 = arith.addf %91, %105 : vector<16x128xf32>
    %c0_42 = arith.constant 0 : index
    %c0_43 = arith.constant 0 : index
    %107 = vector.load %arg15[%c0_42, %c0_43] : memref<1x128xf32, #tpu.memory_space<vmem>>, vector<1x128xf32>
    %c0_44 = arith.constant 0 : index
    %c0_45 = arith.constant 0 : index
    %108 = vector.load %arg16[%c0_44, %c0_45] : memref<1x128xf32, #tpu.memory_space<vmem>>, vector<1x128xf32>
    %cst_46 = arith.constant dense<0.000000e+00> : vector<16xf32>
    %109 = vector.multi_reduction <add>, %106, %cst_46 [1] : vector<16x128xf32> to vector<16xf32>
    %110 = vector.shape_cast %109 : vector<16xf32> to vector<16x1xf32>
    %cst_47 = arith.constant 3.125000e-02 : f32
    %111 = vector.broadcast %cst_47 : f32 to vector<16x1xf32>
    %112 = arith.mulf %110, %111 : vector<16x1xf32>
    %113 = vector.broadcast %112 : vector<16x1xf32> to vector<16x128xf32>
    %114 = arith.subf %106, %113 : vector<16x128xf32>
    %115 = vector.broadcast %0 : vector<1x128xf32> to vector<16x128xf32>
    %116 = arith.mulf %114, %115 : vector<16x128xf32>
    %117 = arith.mulf %116, %116 : vector<16x128xf32>
    %cst_48 = arith.constant dense<0.000000e+00> : vector<16xf32>
    %118 = vector.multi_reduction <add>, %117, %cst_48 [1] : vector<16x128xf32> to vector<16xf32>
    %119 = vector.shape_cast %118 : vector<16xf32> to vector<16x1xf32>
    %cst_49 = arith.constant 3.125000e-02 : f32
    %120 = vector.broadcast %cst_49 : f32 to vector<16x1xf32>
    %121 = arith.mulf %119, %120 : vector<16x1xf32>
    %cst_50 = arith.constant 9.99999974E-6 : f32
    %122 = vector.broadcast %cst_50 : f32 to vector<16x1xf32>
    %123 = arith.addf %121, %122 : vector<16x1xf32>
    %124 = math.rsqrt %123 : vector<16x1xf32>
    %125 = vector.broadcast %124 : vector<16x1xf32> to vector<16x128xf32>
    %126 = arith.mulf %116, %125 : vector<16x128xf32>
    %127 = vector.broadcast %107 : vector<1x128xf32> to vector<16x128xf32>
    %128 = arith.mulf %126, %127 : vector<16x128xf32>
    %129 = vector.broadcast %108 : vector<1x128xf32> to vector<16x128xf32>
    %130 = arith.addf %128, %129 : vector<16x128xf32>
    %131 = arith.truncf %130 : vector<16x128xf32> to vector<16x128xbf16>
    %c0_51 = arith.constant 0 : index
    %c0_52 = arith.constant 0 : index
    %132 = vector.load %arg17[%c0_51, %c0_52] : memref<128x128xbf16, #tpu.memory_space<vmem>>, vector<128x128xbf16>
    %cst_53 = arith.constant dense<0.000000e+00> : vector<16x128xf32>
    %133 = tpu.matmul %131, %132, %cst_53 {dimension_numbers = #tpu.dot_dimension_numbers<[1], [0], [0], [1], [0, 0, 1, 1], [], []>} : vector<16x128xbf16>, vector<128x128xbf16>, vector<16x128xf32> -> vector<16x128xf32>
    %c0_54 = arith.constant 0 : index
    %c0_55 = arith.constant 0 : index
    %134 = vector.load %arg18[%c0_54, %c0_55] : memref<1x128xf32, #tpu.memory_space<vmem>>, vector<1x128xf32>
    %135 = vector.broadcast %134 : vector<1x128xf32> to vector<16x128xf32>
    %136 = arith.addf %133, %135 : vector<16x128xf32>
    %137 = arith.negf %136 : vector<16x128xf32>
    %138 = math.exp %137 : vector<16x128xf32>
    %cst_56 = arith.constant 1.000000e+00 : f32
    %139 = vector.broadcast %cst_56 : f32 to vector<16x128xf32>
    %140 = arith.addf %139, %138 : vector<16x128xf32>
    %141 = arith.divf %139, %140 : vector<16x128xf32>
    %c0_57 = arith.constant 0 : index
    %c0_58 = arith.constant 0 : index
    %142 = vector.load %arg19[%c0_57, %c0_58] : memref<16x128xf32, #tpu.memory_space<vmem>>, vector<16x128xf32>
    tpu.vector_store %arg19[%c0_57, %c0_58], %141 {strides = array<i32>} : memref<16x128xf32, #tpu.memory_space<vmem>>, vector<16x128xf32>,
    return
  }
  func.func @transform_0(%arg0: i32) -> (i32, i32) {
    %c0_i32 = arith.constant 0 : i32
    %c0_i32_0 = arith.constant 0 : i32
    %c0_i32_1 = arith.constant 0 : i32
    return %c0_i32, %c0_i32_0 : i32, i32
  }
  func.func @transform_1(%arg0: i32) -> (i32, i32) {
    %c0_i32 = arith.constant 0 : i32
    %c0_i32_0 = arith.constant 0 : i32
    %c0_i32_1 = arith.constant 0 : i32
    return %c0_i32, %c0_i32_0 : i32, i32
  }
  func.func @transform_2(%arg0: i32) -> (i32, i32) {
    %c0_i32 = arith.constant 0 : i32
    %c0_i32_0 = arith.constant 0 : i32
    %c0_i32_1 = arith.constant 0 : i32
    return %c0_i32, %c0_i32_0 : i32, i32
  }
  func.func @transform_3(%arg0: i32) -> (i32, i32) {
    %c0_i32 = arith.constant 0 : i32
    %c0_i32_0 = arith.constant 0 : i32
    %c0_i32_1 = arith.constant 0 : i32
    return %c0_i32, %c0_i32_0 : i32, i32
  }
  func.func @transform_4(%arg0: i32) -> (i32, i32) {
    %c0_i32 = arith.constant 0 : i32
    %c0_i32_0 = arith.constant 0 : i32
    %c0_i32_1 = arith.constant 0 : i32
    return %c0_i32, %c0_i32_0 : i32, i32
  }
  func.func @transform_5(%arg0: i32) -> (i32, i32) {
    %c0_i32 = arith.constant 0 : i32
    %c0_i32_0 = arith.constant 0 : i32
    %c0_i32_1 = arith.constant 0 : i32
    return %c0_i32, %c0_i32_0 : i32, i32
  }
  func.func @transform_6(%arg0: i32) -> (i32, i32) {
    %c0_i32 = arith.constant 0 : i32
    %c0_i32_0 = arith.constant 0 : i32
    %c0_i32_1 = arith.constant 0 : i32
    return %c0_i32, %c0_i32_0 : i32, i32
  }
  func.func @transform_7(%arg0: i32) -> (i32, i32) {
    %c0_i32 = arith.constant 0 : i32
    %c0_i32_0 = arith.constant 0 : i32
    %c0_i32_1 = arith.constant 0 : i32
    return %c0_i32, %c0_i32_0 : i32, i32
  }
  func.func @transform_8(%arg0: i32) -> (i32, i32) {
    %c0_i32 = arith.constant 0 : i32
    %c0_i32_0 = arith.constant 0 : i32
    %c0_i32_1 = arith.constant 0 : i32
    return %c0_i32, %c0_i32_0 : i32, i32
  }
  func.func @transform_9(%arg0: i32) -> (i32, i32) {
    %c0_i32 = arith.constant 0 : i32
    %c0_i32_0 = arith.constant 0 : i32
    %c0_i32_1 = arith.constant 0 : i32
    return %c0_i32, %c0_i32_0 : i32, i32
  }
  func.func @transform_10(%arg0: i32) -> (i32, i32) {
    %c0_i32 = arith.constant 0 : i32
    %c0_i32_0 = arith.constant 0 : i32
    %c0_i32_1 = arith.constant 0 : i32
    return %c0_i32, %c0_i32_0 : i32, i32
  }
  func.func @transform_11(%arg0: i32) -> (i32, i32) {
    %c0_i32 = arith.constant 0 : i32
    %c0_i32_0 = arith.constant 0 : i32
    %c0_i32_1 = arith.constant 0 : i32
    return %c0_i32, %c0_i32_0 : i32, i32
  }
  func.func @transform_12(%arg0: i32) -> (i32, i32) {
    %c0_i32 = arith.constant 0 : i32
    %c0_i32_0 = arith.constant 0 : i32
    %c0_i32_1 = arith.constant 0 : i32
    return %c0_i32, %c0_i32_0 : i32, i32
  }
  func.func @transform_13(%arg0: i32) -> (i32, i32) {
    %c0_i32 = arith.constant 0 : i32
    %c0_i32_0 = arith.constant 0 : i32
    %c0_i32_1 = arith.constant 0 : i32
    return %c0_i32, %c0_i32_0 : i32, i32
  }
  func.func @transform_14(%arg0: i32) -> (i32, i32) {
    %c0_i32 = arith.constant 0 : i32
    %c0_i32_0 = arith.constant 0 : i32
    %c0_i32_1 = arith.constant 0 : i32
    return %c0_i32, %c0_i32_0 : i32, i32
  }
  func.func @transform_15(%arg0: i32) -> (i32, i32) {
    %c0_i32 = arith.constant 0 : i32
    %c0_i32_0 = arith.constant 0 : i32
    %c0_i32_1 = arith.constant 0 : i32
    return %c0_i32, %c0_i32_0 : i32, i32
  }
  func.func @transform_16(%arg0: i32) -> (i32, i32) {
    %c0_i32 = arith.constant 0 : i32
    %c0_i32_0 = arith.constant 0 : i32
    %c0_i32_1 = arith.constant 0 : i32
    return %c0_i32, %c0_i32_0 : i32, i32
  }
  func.func @transform_17(%arg0: i32) -> (i32, i32) {
    %c0_i32 = arith.constant 0 : i32
    %c0_i32_0 = arith.constant 0 : i32
    %c0_i32_1 = arith.constant 0 : i32
    return %c0_i32, %c0_i32_0 : i32, i32
  }
  func.func @transform_18(%arg0: i32) -> (i32, i32) {
    %c0_i32 = arith.constant 0 : i32
    %c0_i32_0 = arith.constant 0 : i32
    %c0_i32_1 = arith.constant 0 : i32
    return %c0_i32, %c0_i32_0 : i32, i32
  }
}

</mosaic_0001>

<bundles_post_ra>
// kernel: transformer_forward_pallas.1
= control target key start
LH: loop header
LB: loop body
LE: loop exit
PB: predicated region body
PF: predicated region fallthrough
CT: control target
= control target key end

     0   :  { %s3400_s0 = inlined_call_operand.vmem [shape: f32[16,8], index: 0, kind: input, shape index: {}]   ;;  %s3401_s1 = inlined_call_operand.vmem [shape: f32[8,128], index: 1, kind: input, shape index: {}]   ;;  %s3402_s2 = inlined_call_operand.vmem [shape: f32[1,128], index: 2, kind: input, shape index: {}]   ;;  %s3403_s3 = inlined_call_operand.vmem [shape: bf16[8,128], index: 3, kind: input, shape index: {}]   ;;  %s3404_s4 = inlined_call_operand.hbm [shape: bf16[128,384], index: 4, kind: input, shape index: {}]   ;;  %s3405_s5 = inlined_call_operand.vmem [shape: f32[1,384], index: 5, kind: input, shape index: {}]   ;;  %s3406_s6 = inlined_call_operand.vmem [shape: bf16[32,128], index: 6, kind: input, shape index: {}]   ;;  %s3407_s7 = inlined_call_operand.hbm [shape: f32[1,128], index: 7, kind: input, shape index: {}]   ;;  %s3408_s8 = inlined_call_operand.hbm [shape: f32[1,128], index: 8, kind: input, shape index: {}]   ;;  %s3409_s9 = inlined_call_operand.hbm [shape: f32[1,128], index: 9, kind: input, shape index: {}]   ;;  %s3410_s10 = inlined_call_operand.vmem [shape: bf16[128,128], index: 10, kind: input, shape index: {}]   ;;  %s3411_s11 = inlined_call_operand.vmem [shape: f32[1,128], index: 11, kind: input, shape index: {}]   ;;  %s3412_s12 = inlined_call_operand.hbm [shape: bf16[128,128], index: 12, kind: input, shape index: {}]   ;;  %s3413_s13 = inlined_call_operand.vmem [shape: f32[1,128], index: 13, kind: input, shape index: {}]   ;;  %s3414_s14 = inlined_call_operand.vmem [shape: f32[1,128], index: 14, kind: input, shape index: {}]   ;;  %s3415_s15 = inlined_call_operand.vmem [shape: f32[1,128], index: 15, kind: input, shape index: {}]   ;;  %s3416_s16 = inlined_call_operand.hbm [shape: bf16[128,128], index: 16, kind: input, shape index: {}]   ;;  %s3417_s17 = inlined_call_operand.vmem [shape: f32[1,128], index: 17, kind: input, shape index: {}]   ;;  %s3418_s18 = inlined_call_operand.vmem [shape: f32[16,128], index: 18, kind: output, shape index: {}]  }
   0x1   :  { %3420 = sst [smem:[#allocation16_spill]] %s3400_s0 }
   0x2   :  { %3421 = sst [smem:[#allocation17_spill]] %s3401_s1 }
   0x3   :  { %3422 = sst [smem:[#allocation18_spill]] %s3402_s2 }
   0x4   :  { %23 = vsyncpa [#allocation3], 0 }
   0x5   :  { %24 = vsyncpa [#allocation5], 0 }
   0x6   :  { %25 = vsyncpa [#allocation8], 0 }
   0x7   :  { %26 = vsyncpa [#allocation11], 0  ;;  %s2947_s27 = smov [#allocation4]   ;;  %s2948_s29 = smov [#allocation7]  }
   0x8   :  { %s57_s28 = sshll.u32 %s2947_s27, 4  ;;  %s77_s30 = sshll.u32 %s2948_s29, 4  ;;  %s58_s28 = int_to_ptr.vmem [resolvable:$true] %s57_s28  ;;  %s78_s30 = int_to_ptr.vmem [resolvable:$true] %s77_s30 }
   0x9   :  { %s2807_s1 = scalar_lea.hbm %s3407_s7, 16 }
   0xa   :  { %p2808_p0 = scmp.ne.s32.totalorder %s3407_s7, %s2807_s1  ;;  %p2811_p1 = scmp.lt.u32.totalorder %s2807_s1, %s3407_s7 }
   0xc   :  { %p2813_p2 = pnand %p2811_p1, %p2808_p0 }
   0xe   :  { %2816 = shalt.err (!%p2813_p2)
}
   0xf   :  { %s2817_s23 = scalar_lea.vmem %s58_s28, 16  ;;  %s2821_s24 = scalar_lea.vmem %s58_s28, 32 }
  0x10   :  { %p2818_p3 = scmp.ne.s32.totalorder %s58_s28, %s2817_s23  ;;  %p2822_p4 = scmp.lt.s32.totalorder %s58_s28, %s58_s28 }
  0x11   :  { %p2823_p5 = scmp.lt.s32.totalorder %s2821_s24, %s2817_s23 }
  0x13   :  { %p2824_p6 = por %p2823_p5, %p2822_p4 }
  0x15   :  { %p2825_p7 = pnand %p2824_p6, %p2818_p3 }
  0x17   :  { %2828 = shalt.err (!%p2825_p7)
}
  0x18   :  { %60 = dma.hbm_to_vmem [thread:$0]  %s3407_s7, 16, %s58_s28, [#allocation5]  }
  0x19   :  { %s2829_s0 = scalar_lea.hbm %s3409_s9, 16 }
  0x1a   :  { %p2830_p8 = scmp.ne.s32.totalorder %s3409_s9, %s2829_s0  ;;  %p2833_p9 = scmp.lt.u32.totalorder %s2829_s0, %s3409_s9 }
  0x1c   :  { %p2835_p10 = pnand %p2833_p9, %p2830_p8 }
  0x1e   :  { %2838 = shalt.err (!%p2835_p10)
}
  0x1f   :  { %s2839_s22 = scalar_lea.vmem %s78_s30, 16  ;;  %s2843_s2 = scalar_lea.vmem %s78_s30, 32 }
  0x20   :  { %p2840_p11 = scmp.ne.s32.totalorder %s78_s30, %s2839_s22  ;;  %p2844_p12 = scmp.lt.s32.totalorder %s78_s30, %s78_s30 }
  0x21   :  { %p2845_p13 = scmp.lt.s32.totalorder %s2843_s2, %s2839_s22 }
  0x23   :  { %p2846_p0 = por %p2845_p13, %p2844_p12 }
  0x25   :  { %p2847_p1 = pnand %p2846_p0, %p2840_p11 }
  0x27   :  { %2850 = shalt.err (!%p2847_p1)
}
  0x28   :  { %80 = dma.hbm_to_vmem [thread:$0]  %s3409_s9, 16, %s78_s30, [#allocation8]  }
  0x29   :  { %s2949_s23 = smov [#allocation2]   ;;  %s2851_s27 = scalar_lea.hbm %s3404_s4, 3072 }
  0x2a   :  { %s40_s24 = sshll.u32 %s2949_s23, 4  ;;  %p2852_p2 = scmp.ne.s32.totalorder %s3404_s4, %s2851_s27  ;;  %s41_s24 = int_to_ptr.vmem [resolvable:$true] %s40_s24 }
  0x2b   :  { %p2855_p3 = scmp.lt.u32.totalorder %s2851_s27, %s3404_s4 }
  0x2d   :  { %p2857_p4 = pnand %p2855_p3, %p2852_p2 }
  0x2f   :  { %2860 = shalt.err (!%p2857_p4)
}
  0x30   :  { %s2861_s20 = scalar_lea.vmem %s41_s24, 3072  ;;  %p2866_p6 = scmp.lt.s32.totalorder %s41_s24, %s41_s24 }
  0x31   :  { %p2862_p5 = scmp.ne.s32.totalorder %s41_s24, %s2861_s20  ;;  %p2867_p7 = scmp.lt.s32.totalorder %s2861_s20, %s2861_s20 }
  0x33   :  { %p2868_p8 = por %p2867_p7, %p2866_p6 }
  0x35   :  { %p2869_p9 = pnand %p2868_p8, %p2862_p5 }
  0x37   :  { %2872 = shalt.err (!%p2869_p9)
}
  0x38   :  { %s2950_s9 = smov 192   ;;  %s2951_s30 = smov 12  }
  0x39   :  { %46 = dma.hbm_to_vmem [thread:$0]  %s3404_s4, 3072, %s41_s24, [#allocation3], %s2950_s9, %s2950_s9, %s2951_s30  }
  0x3a   :  { %s2952_s2 = smov [#allocation6]   ;;  %s2953_s28 = smov [#allocation9]  }
  0x3b   :  { %s67_s7 = sshll.u32 %s2952_s2, 4  ;;  %s90_s23 = sshll.u32 %s2953_s28, 4  ;;  %s68_s7 = int_to_ptr.vmem [resolvable:$true] %s67_s7  ;;  %s91_s23 = int_to_ptr.vmem [resolvable:$true] %s90_s23 }
  0x3c   :  { %s2873_s27 = scalar_lea.hbm %s3408_s8, 16 }
  0x3d   :  { %p2874_p10 = scmp.ne.s32.totalorder %s3408_s8, %s2873_s27  ;;  %p2877_p11 = scmp.lt.u32.totalorder %s2873_s27, %s3408_s8 }
  0x3f   :  { %p2879_p12 = pnand %p2877_p11, %p2874_p10 }
  0x41   :  { %2882 = shalt.err (!%p2879_p12)
}
  0x42   :  { %s2883_s4 = scalar_lea.vmem %s68_s7, 16  ;;  %s2887_s24 = scalar_lea.vmem %s68_s7, 32 }
  0x43   :  { %p2884_p13 = scmp.ne.s32.totalorder %s68_s7, %s2883_s4  ;;  %p2888_p0 = scmp.lt.s32.totalorder %s68_s7, %s68_s7 }
  0x44   :  { %p2889_p1 = scmp.lt.s32.totalorder %s2887_s24, %s2883_s4 }
  0x46   :  { %p2890_p2 = por %p2889_p1, %p2888_p0 }
  0x48   :  { %p2891_p3 = pnand %p2890_p2, %p2884_p13 }
  0x4a   :  { %2894 = shalt.err (!%p2891_p3)
}
  0x4b   :  { %70 = dma.hbm_to_vmem [thread:$0]  %s3408_s8, 16, %s68_s7, [#allocation5]  }
  0x4c   :  { %s2895_s22 = scalar_lea.hbm %s3412_s12, 1024 }
  0x4d   :  { %p2896_p4 = scmp.ne.s32.totalorder %s3412_s12, %s2895_s22  ;;  %p2899_p5 = scmp.lt.u32.totalorder %s2895_s22, %s3412_s12 }
  0x4f   :  { %p2901_p6 = pnand %p2899_p5, %p2896_p4 }
  0x51   :  { %2904 = shalt.err (!%p2901_p6)
}
  0x52   :  { %s2905_s27 = scalar_lea.vmem %s91_s23, 1024  ;;  %p2910_p8 = scmp.lt.s32.totalorder %s91_s23, %s91_s23 }
  0x53   :  { %p2906_p7 = scmp.ne.s32.totalorder %s91_s23, %s2905_s27  ;;  %p2911_p9 = scmp.lt.s32.totalorder %s2905_s27, %s2905_s27 }
  0x55   :  { %p2912_p10 = por %p2911_p9, %p2910_p8 }
  0x57   :  { %p2913_p11 = pnand %p2912_p10, %p2906_p7 }
  0x59   :  { %2916 = shalt.err (!%p2913_p11)
}
  0x5a   :  { %s2954_s8 = smov 64   ;;  %s2955_s7 = smov 4  }
  0x5b   :  { %96 = dma.hbm_to_vmem [thread:$0]  %s3412_s12, 1024, %s91_s23, [#allocation8], %s2954_s8, %s2954_s8, %s2955_s7  }
  0x5c   :  { %s2956_s19 = smov [#allocation10]   ;;  %s2917_s20 = scalar_lea.hbm %s3416_s16, 1024 }
  0x5d   :  { %s108_s1 = sshll.u32 %s2956_s19, 4  ;;  %p2918_p12 = scmp.ne.s32.totalorder %s3416_s16, %s2917_s20  ;;  %s109_s1 = int_to_ptr.vmem [resolvable:$true] %s108_s1 }
  0x5e   :  { %p2921_p13 = scmp.lt.u32.totalorder %s2917_s20, %s3416_s16 }
  0x60   :  { %p2923_p0 = pnand %p2921_p13, %p2918_p12 }
  0x62   :  { %2926 = shalt.err (!%p2923_p0)
}
  0x63   :  { %s2927_s2 = scalar_lea.vmem %s109_s1, 1024  ;;  %p2932_p2 = scmp.lt.s32.totalorder %s109_s1, %s109_s1 }
  0x64   :  { %p2928_p1 = scmp.ne.s32.totalorder %s109_s1, %s2927_s2  ;;  %p2933_p3 = scmp.lt.s32.totalorder %s2927_s2, %s2927_s2 }
  0x66   :  { %p2934_p4 = por %p2933_p3, %p2932_p2 }
  0x68   :  { %p2935_p5 = pnand %p2934_p4, %p2928_p1 }
  0x6a   :  { %2938 = shalt.err (!%p2935_p5)
}
  0x6b   :  { %114 = dma.hbm_to_vmem [thread:$0]  %s3416_s16, 1024, %s109_s1, [#allocation11], %s2954_s8, %s2954_s8, %s2955_s7  }
  0x6c   :  { %2939 = dma.done.wait [#allocation3], 3072  }
  0x6d   :  { %2940 = vsyncadd [#allocation3], 4294964224 }
  0x6e   :  { %2941 = dma.done.wait [#allocation5], 32  }
  0x6f   :  { %2942 = vsyncadd [#allocation5], 4294967264 }
  0x70   :  { %2943 = dma.done.wait [#allocation8], 1040  }
  0x71   :  { %2944 = vsyncadd [#allocation8], 4294966256 }
  0x72   :  { %2945 = dma.done.wait [#allocation11], 1024  }
  0x73   :  { %2946 = vsyncadd [#allocation11], 4294966272  ;;  %v2957_v0 = vmov 0.0   ;;  %vm2958_vm0 = vmmov 0   ;;  %vm145_vm1 = vcmask 1043456   ;;  %s3423_s27 = sld [smem:[#allocation16_spill]]  ;;  %v228_v39 = vlaneseq }
  0x74   :  { %2493 = vmatprep.subr.bf16.mxu1 %v2957_v0  ;;  %2495 = vmatprep.mubr.msk.bf16.mxu1 %vm2958_vm0, %v2957_v0  ;;  %v140_v1 = vld [vmem:[%s3403_s3] sm:$0xf]  ;;  %vm141_vm2 = vcmask 64512   ;;  %v2701_v6 = vld [vmem:[#allocation2] ss:$12 sps:$4 sm:$0xff]   ;;  %v2959_v30 = vmov 0  }
  0x75   :  { %2499 = vmatprep.subr.bf16.mxu0 %v2957_v0  ;;  %2515 = vmatprep.mubr.msk.bf16.mxu0 %vm2958_vm0, %v2957_v0  ;;  %v147_v4 = vsel %vm145_vm1, %v140_v1, 0  ;;  %v2703_v7 = vld [vmem:[#allocation2 + $0x4] ss:$12 sps:$4 sm:$0xff]   ;;  %v2704_v8 = vld [vmem:[#allocation2 + $0x8] ss:$12 sps:$4 sm:$0xff]   ;;  %s3424_s0 = sld [smem:[#allocation17_spill]] }
  0x76   :  { %2494 = vmatpush3.bf16.msra.mxu1 %v147_v4  ;;  %v2707_v9 = vld [vmem:[#allocation2 + $0x1c] ss:$12 sps:$4 sm:$0xff]   ;;  %2500 = vmatpush3.bf16.msra.mxu0 %v2704_v8  ;;  %v2708_v10 = vld [vmem:[#allocation2 + $0x20] ss:$12 sps:$4 sm:$0xff]   ;;  %v2705_v11 = vld [vmem:[#allocation2 + $0x18] ss:$12 sps:$4 sm:$0xff]  }
  0x77   :  { %371 = vmatprep.subr.bf16.mxu1 %v2703_v7  ;;  %2501 = vmatprep.subr.bf16.mxu0 %v2957_v0  ;;  %v2711_v12 = vld [vmem:[#allocation2 + $0x34] ss:$12 sps:$4 sm:$0xff]   ;;  %v2712_v13 = vld [vmem:[#allocation2 + $0x38] ss:$12 sps:$4 sm:$0xff]   ;;  %v2709_v14 = vld [vmem:[#allocation2 + $0x30] ss:$12 sps:$4 sm:$0xff]  }
  0x78   :  { %v2715_v15 = vld [vmem:[#allocation2 + $0x4c] ss:$12 sps:$4 sm:$0xff]   ;;  %v2716_v16 = vld [vmem:[#allocation2 + $0x50] ss:$12 sps:$4 sm:$0xff]   ;;  %v2713_v17 = vld [vmem:[#allocation2 + $0x48] ss:$12 sps:$4 sm:$0xff]  }
  0x79   :  { %v137_v2 = vld [vmem:[%s3423_s27] sm:$0xff]  ;;  %v138_v3 = vld [vmem:[%s3423_s27 + $0x8] sm:$0xff]  ;;  %v2717_v19 = vld [vmem:[#allocation2 + $0x60] ss:$12 sps:$4 sm:$0xff]   ;;  %v3171_v40 = vshrl.u32 %v228_v39, 7  ;;  %s2960_s4 = smov 120  }
  0x7a   :  { %v139_v5 = vpack.c.bf16 %v138_v3, %v137_v2  ;;  %2502 = vmatpush3.bf16.msra.mxu0 %v2708_v10  ;;  %v2719_v18 = vld [vmem:[#allocation2 + $0x64] ss:$12 sps:$4 sm:$0xff]   ;;  %v2720_v20 = vld [vmem:[#allocation2 + $0x68] ss:$12 sps:$4 sm:$0xff]   ;;  %v2724_v22 = vld [vmem:[#allocation2 + $0x80] ss:$12 sps:$4 sm:$0xff]  }
  0x7b   :  { %2503 = vmatprep.subr.bf16.mxu0 %v2957_v0  ;;  %v2723_v21 = vld [vmem:[#allocation2 + $0x7c] ss:$12 sps:$4 sm:$0xff]   ;;  %v2721_v23 = vld [vmem:[#allocation2 + $0x78] ss:$12 sps:$4 sm:$0xff]   ;;  %v2727_v24 = vld [vmem:[#allocation2 + $0x94] ss:$12 sps:$4 sm:$0xff]  }
  0x7c   :  { %2496 = vmatmul.mubr.msk.bf16.vlgmr.msra.gmra.mrb[0].mxu1 %vm141_vm2, %v139_v5  ;;  %v2725_v25 = vld [vmem:[#allocation2 + $0x90] ss:$12 sps:$4 sm:$0xff]   ;;  %v2728_v26 = vld [vmem:[#allocation2 + $0x98] ss:$12 sps:$4 sm:$0xff]   ;;  %v2729_v28 = vld [vmem:[#allocation2 + $0xa8] ss:$12 sps:$4 sm:$0xff]  }
  0x7d   :  { %372 = vmatpush1.bf16.msra.mxu1 %v2701_v6  ;;  %v2731_v27 = vld [vmem:[#allocation2 + $0xac] ss:$12 sps:$4 sm:$0xff]   ;;  %v2732_v29 = vld [vmem:[#allocation2 + $0xb0] ss:$12 sps:$4 sm:$0xff]   ;;  %403 = vmatprep.mubr.bf16.mxu1 %v2959_v30  ;;  %v230_v41 = vsub.s32 0, %v3171_v40  ;;  %v234_v43 = vsub.s32 1, %v3171_v40 }
  0x7e   :  { %373 = vmatprep.subr.bf16.mxu1 %v2707_v9  ;;  %2504 = vmatpush3.bf16.msra.mxu0 %v2712_v13  ;;  %v190_v32 = vld [vmem:[%s3424_s0] sm:$0xff]  ;;  %s2962_s24 = smov 104   ;;  %v238_v2 = vsub.s32 2, %v3171_v40  ;;  %s2963_s22 = smov 8   ;;  %vm1801_vm3 = vcmask 130048   ;;  %vm1804_vm4 = vcmask 195584  }
  0x7f   :  { %2505 = vmatprep.subr.bf16.mxu0 %v2957_v0  ;;  %v226_v42 = vld [vmem:[%s3405_s5] sm:$0x7]  ;;  %s2961_s5 = smov 112   ;;  %s2964_s2 = smov 16   ;;  %vm1831_vm5 = vcmask 261120  }
  0x80   :  { %v231_v44 = vrot.slane %v226_v42, %v230_v41  ;;  %v235_v45 = vrot.slane %v226_v42, %v234_v43  ;;  %v239_v5 = vrot.slane %v226_v42, %v238_v2  ;;  %s2965_s12 = smov 24   ;;  %s3425_s27 = sld [smem:[#allocation18_spill]] }
  0x81   :  { %374 = vmatpush1.bf16.msra.mxu1 %v2705_v11 }
  0x82   :  { %375 = vmatprep.subr.bf16.mxu1 %v2711_v12  ;;  %2506 = vmatpush3.bf16.msra.mxu0 %v2716_v16 }
  0x83   :  { %2507 = vmatprep.subr.bf16.mxu0 %v2957_v0 }
  0x85   :  { %376 = vmatpush1.bf16.msra.mxu1 %v2709_v14 }
  0x86   :  { %377 = vmatprep.subr.bf16.mxu1 %v2715_v15  ;;  %2508 = vmatpush3.bf16.msra.mxu0 %v2720_v20 }
  0x87   :  { %2509 = vmatprep.subr.bf16.mxu0 %v2957_v0 }
  0x89   :  { %378 = vmatpush1.bf16.msra.mxu1 %v2713_v17 }
  0x8a   :  { %379 = vmatprep.subr.bf16.mxu1 %v2719_v18  ;;  %2510 = vmatpush3.bf16.msra.mxu0 %v2724_v22 }
  0x8b   :  { %2511 = vmatprep.subr.bf16.mxu0 %v2957_v0 }
  0x8d   :  { %380 = vmatpush1.bf16.msra.mxu1 %v2717_v19 }
  0x8e   :  { %381 = vmatprep.subr.bf16.mxu1 %v2723_v21  ;;  %2512 = vmatpush3.bf16.msra.mxu0 %v2728_v26 }
  0x8f   :  { %2513 = vmatprep.subr.bf16.mxu0 %v2957_v0 }
  0x91   :  { %382 = vmatpush1.bf16.msra.mxu1 %v2721_v23 }
  0x92   :  { %383 = vmatprep.subr.bf16.mxu1 %v2727_v24  ;;  %2514 = vmatpush3.bf16.msra.mxu0 %v2732_v29 }
  0x93   :  { %2544 = vmatprep.subr.mxu0 %v2957_v0 }
  0x95   :  { %384 = vmatpush1.bf16.msra.mxu1 %v2725_v25 }
  0x96   :  { %385 = vmatprep.subr.bf16.mxu1 %v2731_v27 }
  0x99   :  { %386 = vmatpush1.bf16.msra.mxu1 %v2729_v28 }
  0x9a   :  { %2519 = vmatprep.subr.mxu1 %v2957_v0 }
 0x14f   :  { %v183_v31 = vpop.f32.mrb[0].mxu1 }
 0x150   :  { %v2497_v33 = vpop.f32.mrb[1].mxu1  ;;  %v3161_v35 = vadd.f32 %v190_v32, %v183_v31 }
 0x151   :  { %v186_v34 = vpop.f32.mrb[2].mxu1 }
 0x152   :  { %v3163_v36 = vadd.f32 %v190_v32, %v186_v34  ;;  %v2498_v37 = vpop.f32.mrb[3].mxu1 }
 0x154   :  { %v193_v38 = vpack.c.bf16 %v3163_v36, %v3161_v35 }
 0x156   :  { %404 = vmatmul.mubr.bf16.vlgmr.msra.gmra.mrb[4].mxu1 %v193_v38  ;;  %2516 = vmatmul.mubr.bf16.vlgmr.msra.gmra.mrb[0].mxu0 %v193_v38 }
 0x157   :  { %2521 = vmatprep.mubr.msk.f32.mxu1 %vm2958_vm0, %v2957_v0  ;;  %2546 = vmatprep.mubr.msk.f32.mxu0 %vm2958_vm0, %v2957_v0 }
 0x229   :  { %v405_v46 = vpop.f32.mrb[4].mxu1  ;;  %v3178_v47 = vpop.f32.mrb[0].mxu0 }
 0x22a   :  { %v406_v48 = vadd.f32 %v405_v46, %v231_v44  ;;  %v407_v49 = vpop.f32.mrb[5].mxu1  ;;  %v2517_v50 = vpop.f32.mrb[1].mxu0  ;;  %v3226_v8 = vadd.f32 %v3178_v47, %v239_v5 }
 0x22b   :  { %v408_v51 = vadd.f32 %v407_v49, %v235_v45  ;;  %v409_v52 = vpop.f32.mrb[6].mxu1  ;;  %v451_v53 = vpop.f32.mrb[2].mxu0 }
 0x22c   :  { %v410_v54 = vadd.f32 %v409_v52, %v231_v44  ;;  %v411_v55 = vpop.f32.mrb[7].mxu1  ;;  %v2518_v56 = vpop.f32.mrb[3].mxu0  ;;  %457 = vrot.lane.b32.xlu0 %v406_v48, %s2960_s4  ;;  %v3230_v9 = vadd.f32 %v451_v53, %v239_v5 }
 0x22d   :  { %2520 = vmatpush3.xpose.msk.msra.mxu1 %vm141_vm2, %v408_v51  ;;  %v412_v57 = vadd.f32 %v411_v55, %v235_v45 }
 0x22e   :  { %459 = vrot.lane.b32.xlu1 %v410_v54, %s2960_s4  ;;  %2524 = vmatprep.subr.mxu1 %v2957_v0 }
 0x230   :  { %471 = vrot.lane.b32.xlu0 %v408_v51, %s2960_s4  ;;  %2522 = vmatmul.mubr.msk.f32.vlgmr.msra.gmra.mrb[8].mxu1 %vm141_vm2, %v406_v48 }
 0x231   :  { %2525 = vmatpush3.xpose.msk.msra.mxu1 %vm141_vm2, %v412_v57  ;;  %2526 = vmatprep.mubr.msk.f32.mxu1 %vm2958_vm0, %v2957_v0 }
 0x232   :  { %463 = vrot.lane.b32.xlu1 %v410_v54, %s2961_s5  ;;  %2529 = vmatprep.subr.mxu1 %v2957_v0 }
 0x234   :  { %461 = vrot.lane.b32.xlu0 %v406_v48, %s2961_s5  ;;  %2527 = vmatmul.mubr.msk.f32.vlgmr.msra.gmra.mrb[10].mxu1 %vm141_vm2, %v410_v54 }
 0x235   :  { %2531 = vmatprep.mubr.msk.f32.mxu1 %vm2958_vm0, %v2957_v0 }
 0x236   :  { %473 = vrot.lane.b32.xlu1 %v412_v57, %s2960_s4 }
 0x238   :  { %475 = vrot.lane.b32.xlu0 %v408_v51, %s2961_s5 }
 0x23a   :  { %477 = vrot.lane.b32.xlu1 %v412_v57, %s2961_s5 }
 0x23c   :  { %479 = vrot.lane.b32.xlu0 %v408_v51, %s2962_s24 }
 0x23e   :  { %481 = vrot.lane.b32.xlu1 %v412_v57, %s2962_s24 }
 0x240   :  { %465 = vrot.lane.b32.xlu0 %v406_v48, %s2962_s24 }
 0x242   :  { %467 = vrot.lane.b32.xlu1 %v410_v54, %s2962_s24 }
 0x29e   :  { %v458_v58 = vpop.permute.xlu0 %457 }
 0x2a0   :  { %v460_v59 = vpop.permute.xlu1 %459 }
 0x2a2   :  { %v472_v60 = vpop.permute.xlu0 %471 }
 0x2a3   :  { %2530 = vmatpush3.xpose.msk.msra.mxu1 %vm141_vm2, %v472_v60 }
 0x2a4   :  { %v464_v61 = vpop.permute.xlu1 %463  ;;  %2534 = vmatprep.subr.mxu1 %v2957_v0 }
 0x2a6   :  { %v462_v62 = vpop.permute.xlu0 %461  ;;  %2532 = vmatmul.mubr.msk.f32.vlgmr.msra.gmra.mrb[12].mxu1 %vm141_vm2, %v458_v58 }
 0x2a7   :  { %2536 = vmatprep.mubr.msk.f32.mxu1 %vm2958_vm0, %v2957_v0 }
 0x2a8   :  { %v474_v63 = vpop.permute.xlu1 %473 }
 0x2a9   :  { %2535 = vmatpush3.xpose.msk.msra.mxu1 %vm141_vm2, %v474_v63 }
 0x2aa   :  { %v476_v1 = vpop.permute.xlu0 %475  ;;  %2539 = vmatprep.subr.mxu1 %v2957_v0 }
 0x2ac   :  { %v478_v3 = vpop.permute.xlu1 %477  ;;  %2537 = vmatmul.mubr.msk.f32.vlgmr.msra.gmra.mrb[14].mxu1 %vm141_vm2, %v460_v59 }
 0x2ad   :  { %2540 = vmatpush3.xpose.msk.msra.mxu1 %vm141_vm2, %v476_v1  ;;  %2545 = vmatpush3.xpose.msk.msra.mxu0 %vm141_vm2, %v478_v3 }
 0x2ae   :  { %v480_v4 = vpop.permute.xlu0 %479  ;;  %2541 = vmatprep.mubr.msk.f32.mxu1 %vm2958_vm0, %v2957_v0  ;;  %2554 = vmatprep.subr.mxu0 %v2957_v0 }
 0x2af   :  { %2549 = vmatprep.subr.mxu1 %v2957_v0 }
 0x2b0   :  { %2547 = vmatmul.mubr.msk.f32.vlgmr.msra.gmra.mrb[4].mxu0 %vm141_vm2, %v464_v61  ;;  %v482_v6 = vpop.permute.xlu1 %481  ;;  %2542 = vmatmul.mubr.msk.f32.vlgmr.msra.gmra.mrb[16].mxu1 %vm141_vm2, %v462_v62 }
 0x2b1   :  { %2550 = vmatpush3.xpose.msk.msra.mxu1 %vm141_vm2, %v480_v4  ;;  %2555 = vmatpush3.xpose.msk.msra.mxu0 %vm141_vm2, %v482_v6 }
 0x2b2   :  { %v466_v7 = vpop.permute.xlu0 %465  ;;  %2551 = vmatprep.mubr.msk.f32.mxu1 %vm2958_vm0, %v2957_v0  ;;  %2556 = vmatprep.mubr.msk.f32.mxu0 %vm2958_vm0, %v2957_v0 }
 0x2b3   :  { %2564 = vmatprep.subr.mxu0 %v2957_v0  ;;  %2559 = vmatprep.subr.mxu1 %v2957_v0 }
 0x2b4   :  { %v468_v10 = vpop.permute.xlu1 %467  ;;  %2552 = vmatmul.mubr.msk.f32.vlgmr.msra.gmra.mrb[18].mxu1 %vm141_vm2, %v466_v7 }
 0x2b5   :  { %2557 = vmatmul.mubr.msk.f32.vlgmr.msra.gmra.mrb[6].mxu0 %vm141_vm2, %v468_v10  ;;  %2560 = vmatpush3.msra.mxu1 %v3226_v8 }
 0x2b6   :  { %2565 = vmatpush3.msra.mxu0 %v3230_v9  ;;  %2566 = vmatprep.mubr.msk.f32.mxu0 %vm2958_vm0, %v2957_v0 }
 0x2b7   :  { %2574 = vmatprep.subr.mxu0 %v2957_v0  ;;  %2561 = vmatprep.mubr.msk.f32.mxu1 %vm2958_vm0, %v2957_v0 }
 0x2b8   :  { %2569 = vmatprep.subr.mxu1 %v2957_v0 }
 0x303   :  { %v573_v11 = vpop.f32.mrb[8].mxu1 }
 0x304   :  { %v1095_v12 = vmul.f32 0.35355338, %v573_v11  ;;  %v2523_v13 = vpop.f32.mrb[9].mxu1 }
 0x306   :  { %v1103_v14 = vsel %vm141_vm2, %v1095_v12, -inf }
 0x307   :  { %1104 = vmax.xlane.f32.xlu0 %v1103_v14  ;;  %v647_v15 = vpop.f32.mrb[10].mxu1 }
 0x308   :  { %v1096_v16 = vmul.f32 0.35355338, %v647_v15  ;;  %v2528_v17 = vpop.f32.mrb[11].mxu1 }
 0x30a   :  { %v1106_v18 = vsel %vm141_vm2, %v1096_v16, -inf }
 0x30b   :  { %1107 = vmax.xlane.f32.xlu1 %v1106_v18 }
 0x379   :  { %v721_v19 = vpop.f32.mrb[12].mxu1 }
 0x37a   :  { %v1097_v20 = vmul.f32 0.35355338, %v721_v19  ;;  %v2533_v21 = vpop.f32.mrb[13].mxu1 }
 0x37c   :  { %v1109_v22 = vsel %vm141_vm2, %v1097_v20, -inf }
 0x37d   :  { %1110 = vmax.xlane.f32.xlu0 %v1109_v22 }
 0x37f   :  { %v795_v23 = vpop.f32.mrb[14].mxu1 }
 0x380   :  { %v1098_v24 = vmul.f32 0.35355338, %v795_v23  ;;  %v2538_v25 = vpop.f32.mrb[15].mxu1 }
 0x382   :  { %v1112_v26 = vsel %vm141_vm2, %v1098_v24, -inf }
 0x383   :  { %v943_v27 = vpop.f32.mrb[4].mxu0  ;;  %1113 = vmax.xlane.f32.xlu0 %v1112_v26  ;;  %v869_v28 = vpop.f32.mrb[16].mxu1 }
 0x384   :  { %v1100_v29 = vmul.f32 0.35355338, %v943_v27  ;;  %v1099_v30 = vmul.f32 0.35355338, %v869_v28  ;;  %v2543_v31 = vpop.f32.mrb[17].mxu1  ;;  %v2548_v32 = vpop.f32.mrb[5].mxu0 }
 0x386   :  { %v1118_v33 = vsel %vm141_vm2, %v1100_v29, -inf  ;;  %v1115_v34 = vsel %vm141_vm2, %v1099_v30, -inf }
 0x387   :  { %1119 = vmax.xlane.f32.xlu0 %v1118_v33  ;;  %1116 = vmax.xlane.f32.xlu1 %v1115_v34  ;;  %v1017_v37 = vpop.f32.mrb[18].mxu1 }
 0x388   :  { %v1101_v38 = vmul.f32 0.35355338, %v1017_v37  ;;  %v2553_v39 = vpop.f32.mrb[19].mxu1  ;;  %v1091_v40 = vpop.f32.mrb[6].mxu0 }
 0x389   :  { %v1102_v41 = vmul.f32 0.35355338, %v1091_v40  ;;  %v2558_v42 = vpop.f32.mrb[7].mxu0 }
 0x38a   :  { %v1121_v43 = vsel %vm141_vm2, %v1101_v38, -inf }
 0x38b   :  { %1122 = vmax.xlane.f32.xlu1 %v1121_v43  ;;  %v1124_v44 = vsel %vm141_vm2, %v1102_v41, -inf }
 0x38c   :  { %1125 = vmax.xlane.f32.xlu0 %v1124_v44 }
 0x394   :  { %v1105_v47 = vpop.xlane.xlu0 %1104 }
 0x395   :  { %v1127_v49 = vsub.f32 %v1095_v12, %v1105_v47 }
 0x397   :  { %v1135_v50 = vmul.f32 1.442695, %v1127_v49 }
 0x398   :  { %v1108_v45 = vpop.xlane.xlu1 %1107 }
 0x399   :  { %v1128_v46 = vsub.f32 %v1096_v16, %v1108_v45 }
 0x39b   :  { %v1137_v48 = vmul.f32 1.442695, %v1128_v46 }
 0x39c   :  { %485 = vrot.lane.b32.xlu1 %v3226_v8, %s2960_s4 }
 0x39d   :  { %2759 = vpow2.f32 %v1137_v48 }
 0x39e   :  { %2761 = vpow2.f32 %v1135_v50 }
 0x3a0   :  { %491 = vrot.lane.b32.xlu1 %v3226_v8, %s2961_s5 }
 0x3a2   :  { %487 = vrot.lane.b32.xlu0 %v3230_v9, %s2960_s4 }
 0x3a4   :  { %493 = vrot.lane.b32.xlu1 %v3230_v9, %s2961_s5 }
 0x3a7   :  { %v2760_v51 = vpop.eup %2759 }
 0x3a8   :  { %v1154_v52 = vsel %vm141_vm2, %v2760_v51, 0.0  ;;  %v2762_v53 = vpop.eup %2761 }
 0x3a9   :  { %v1151_v54 = vsel %vm141_vm2, %v2762_v53, 0.0 }
 0x3c1   :  { %1155 = vadd.xlane.f32.xlu0 %v1154_v52 }
 0x3c8   :  { %1152 = vadd.xlane.f32.xlu1 %v1151_v54 }
 0x40a   :  { %v1111_v55 = vpop.xlane.xlu0 %1110 }
 0x40b   :  { %v1129_v56 = vsub.f32 %v1097_v20, %v1111_v55 }
 0x40d   :  { %v1139_v57 = vmul.f32 1.442695, %v1129_v56 }
 0x40f   :  { %2763 = vpow2.f32 %v1139_v57 }
 0x410   :  { %v1114_v58 = vpop.xlane.xlu0 %1113 }
 0x411   :  { %v1130_v59 = vsub.f32 %v1098_v24, %v1114_v58 }
 0x413   :  { %v1141_v1 = vmul.f32 1.442695, %v1130_v59 }
 0x414   :  { %v1120_v60 = vpop.xlane.xlu0 %1119  ;;  %v1117_v61 = vpop.xlane.xlu1 %1116 }
 0x415   :  { %v1132_v62 = vsub.f32 %v1100_v29, %v1120_v60  ;;  %v1131_v63 = vsub.f32 %v1099_v30, %v1117_v61  ;;  %v2733_v60 = vld [vmem:[%s3406_s6] sm:$0xff]  }
 0x417   :  { %v1145_v2 = vmul.f32 1.442695, %v1132_v62  ;;  %v1143_v3 = vmul.f32 1.442695, %v1131_v63 }
 0x418   :  { %v1123_v4 = vpop.xlane.xlu1 %1122 }
 0x419   :  { %v2764_v5 = vpop.eup %2763  ;;  %2765 = vpow2.f32 %v1145_v2  ;;  %v1133_v6 = vsub.f32 %v1101_v38, %v1123_v4  ;;  %v1126_v7 = vpop.xlane.xlu0 %1125 }
 0x41a   :  { %2767 = vpow2.f32 %v1143_v3  ;;  %v1134_v10 = vsub.f32 %v1102_v41, %v1126_v7  ;;  %v1157_v11 = vsel %vm141_vm2, %v2764_v5, 0.0 }
 0x41b   :  { %2769 = vpow2.f32 %v1141_v1  ;;  %v1147_v12 = vmul.f32 1.442695, %v1133_v6  ;;  %1158 = vadd.xlane.f32.xlu1 %v1157_v11  ;;  %v2734_v1 = vld [vmem:[%s3406_s6 + $0x8] sm:$0xff]  }
 0x41c   :  { %v1149_v13 = vmul.f32 1.442695, %v1134_v10  ;;  %v486_v24 = vpop.permute.xlu1 %485 }
 0x41d   :  { %2771 = vpow2.f32 %v1147_v12  ;;  %v488_v25 = vpop.permute.xlu0 %487 }
 0x41e   :  { %2773 = vpow2.f32 %v1149_v13 }
 0x420   :  { %v492_v26 = vpop.permute.xlu1 %491 }
 0x423   :  { %v3261_v14 = vpop.eup %2765 }
 0x424   :  { %v2768_v15 = vpop.eup %2767  ;;  %v1166_v16 = vsel %vm141_vm2, %v3261_v14, 0.0  ;;  %v494_v28 = vpop.permute.xlu1 %493 }
 0x425   :  { %v2770_v17 = vpop.eup %2769  ;;  %1167 = vadd.xlane.f32.xlu0 %v1166_v16  ;;  %v1163_v18 = vsel %vm141_vm2, %v2768_v15, 0.0 }
 0x426   :  { %1164 = vadd.xlane.f32.xlu1 %v1163_v18  ;;  %v1160_v20 = vsel %vm141_vm2, %v2770_v17, 0.0 }
 0x427   :  { %v2772_v19 = vpop.eup %2771 }
 0x428   :  { %v1169_v21 = vsel %vm141_vm2, %v2772_v19, 0.0  ;;  %v3268_v22 = vpop.eup %2773 }
 0x429   :  { %1161 = vadd.xlane.f32.xlu0 %v1160_v20  ;;  %v1172_v23 = vsel %vm141_vm2, %v3268_v22, 0.0 }
 0x42a   :  { %1170 = vadd.xlane.f32.xlu1 %v1169_v21 }
 0x42d   :  { %1173 = vadd.xlane.f32.xlu0 %v1172_v23 }
 0x43b   :  { %499 = vrot.lane.b32.xlu1 %v3230_v9, %s2962_s24 }
 0x443   :  { %497 = vrot.lane.b32.xlu0 %v3226_v8, %s2962_s24 }
 0x44e   :  { %v1156_v27 = vpop.xlane.xlu0 %1155 }
 0x44f   :  { %2775 = vrcp.f32 %v1156_v27 }
 0x455   :  { %v1153_v29 = vpop.xlane.xlu1 %1152 }
 0x456   :  { %2777 = vrcp.f32 %v1153_v29 }
 0x459   :  { %v2776_v30 = vpop.eup %2775 }
 0x45a   :  { %v1184_v31 = vmul.f32 %v2776_v30, %v2760_v51  ;;  %v2382_v30 = vld [vmem:[#allocation4] ss:$0 sm:$0xff] }
 0x45c   :  { %2567 = vmatmul.mubr.msk.f32.vlgmr.msra.gmra.mrb[8].mxu0 %vm141_vm2, %v1184_v31 }
 0x45d   :  { %2575 = vmatpush3.msra.mxu0 %v488_v25  ;;  %2576 = vmatprep.mubr.msk.f32.mxu0 %vm2958_vm0, %v2957_v0 }
 0x45e   :  { %2584 = vmatprep.subr.mxu0 %v2957_v0 }
 0x460   :  { %v2778_v9 = vpop.eup %2777 }
 0x461   :  { %v1183_v8 = vmul.f32 %v2778_v9, %v2762_v53 }
 0x463   :  { %2562 = vmatmul.mubr.msk.f32.vlgmr.msra.gmra.mrb[20].mxu1 %vm141_vm2, %v1183_v8 }
 0x464   :  { %2570 = vmatpush3.msra.mxu1 %v486_v24  ;;  %2571 = vmatprep.mubr.msk.f32.mxu1 %vm2958_vm0, %v2957_v0 }
 0x465   :  { %2579 = vmatprep.subr.mxu1 %v2957_v0 }
 0x4a8   :  { %v1159_v32 = vpop.xlane.xlu1 %1158 }
 0x4a9   :  { %2779 = vrcp.f32 %v1159_v32 }
 0x4b2   :  { %v1168_v33 = vpop.xlane.xlu0 %1167 }
 0x4b3   :  { %v2780_v34 = vpop.eup %2779  ;;  %v1165_v37 = vpop.xlane.xlu1 %1164 }
 0x4b4   :  { %v1185_v38 = vmul.f32 %v2780_v34, %v2764_v5  ;;  %2781 = vrcp.f32 %v1165_v37 }
 0x4b6   :  { %v1162_v39 = vpop.xlane.xlu0 %1161  ;;  %2572 = vmatmul.mubr.msk.f32.vlgmr.msra.gmra.mrb[22].mxu1 %vm141_vm2, %v1185_v38 }
 0x4b7   :  { %2783 = vrcp.f32 %v1162_v39  ;;  %2580 = vmatpush3.msra.mxu1 %v492_v26  ;;  %v1171_v40 = vpop.xlane.xlu1 %1170  ;;  %2581 = vmatprep.mubr.msk.f32.mxu1 %vm2958_vm0, %v2957_v0  ;;  %v2735_v39 = vld [vmem:[%s3410_s10] sm:$0xff]  }
 0x4b8   :  { %2785 = vrcp.f32 %v1171_v40  ;;  %2589 = vmatprep.subr.mxu1 %v2957_v0  ;;  %v2736_v40 = vld [vmem:[%s3410_s10 + $0x8] sm:$0xff]  }
 0x4b9   :  { %2787 = vrcp.f32 %v1168_v33 }
 0x4ba   :  { %v1174_v41 = vpop.xlane.xlu0 %1173 }
 0x4bb   :  { %2789 = vrcp.f32 %v1174_v41  ;;  %v500_v52 = vpop.permute.xlu1 %499 }
 0x4be   :  { %v2782_v42 = vpop.eup %2781  ;;  %v498_v44 = vpop.permute.xlu0 %497 }
 0x4bf   :  { %v1187_v43 = vmul.f32 %v2782_v42, %v2768_v15 }
 0x4c1   :  { %v2784_v45 = vpop.eup %2783  ;;  %2582 = vmatmul.mubr.msk.f32.vlgmr.msra.gmra.mrb[24].mxu1 %vm141_vm2, %v1187_v43 }
 0x4c2   :  { %v2786_v46 = vpop.eup %2785  ;;  %v1186_v47 = vmul.f32 %v2784_v45, %v2770_v17  ;;  %2590 = vmatpush3.msra.mxu1 %v498_v44  ;;  %2591 = vmatprep.mubr.msk.f32.mxu1 %vm2958_vm0, %v2957_v0 }
 0x4c3   :  { %v2788_v48 = vpop.eup %2787  ;;  %v1189_v49 = vmul.f32 %v2786_v46, %v2772_v19  ;;  %2599 = vmatprep.subr.bf16.mxu1 %v2957_v0 }
 0x4c4   :  { %2577 = vmatmul.mubr.msk.f32.vlgmr.msra.gmra.mrb[10].mxu0 %vm141_vm2, %v1186_v47  ;;  %v1188_v50 = vmul.f32 %v2788_v48, %v3261_v14 }
 0x4c5   :  { %2585 = vmatpush3.msra.mxu0 %v494_v28  ;;  %2592 = vmatmul.mubr.msk.f32.vlgmr.msra.gmra.mrb[26].mxu1 %vm141_vm2, %v1189_v49  ;;  %v2790_v51 = vpop.eup %2789 }
 0x4c6   :  { %2586 = vmatprep.mubr.msk.f32.mxu0 %vm2958_vm0, %v2957_v0  ;;  %2594 = vmatprep.subr.mxu0 %v2957_v0  ;;  %v1190_v53 = vmul.f32 %v2790_v51, %v3268_v22  ;;  %v2738_v51 = vld [vmem:[%s3410_s10 + $0x18] sm:$0xff]  }
 0x4c7   :  { %2603 = vmatprep.mubr.msk.bf16.mxu1 %vm2958_vm0, %v2957_v0  ;;  %2600 = vmatpush3.bf16.msra.mxu1 %v2733_v60  ;;  %v2747_v60 = vld [vmem:[#allocation9 + $0x20] sm:$0xff]  }
 0x4c8   :  { %2587 = vmatmul.mubr.msk.f32.vlgmr.msra.gmra.mrb[12].mxu0 %vm141_vm2, %v1188_v50  ;;  %2601 = vmatprep.subr.bf16.mxu1 %v2957_v0  ;;  %v2737_v50 = vld [vmem:[%s3410_s10 + $0x10] sm:$0xff]  }
 0x4c9   :  { %2595 = vmatpush3.msra.mxu0 %v500_v52  ;;  %2596 = vmatprep.mubr.msk.f32.mxu0 %vm2958_vm0, %v2957_v0  ;;  %v2739_v52 = vld [vmem:[%s3410_s10 + $0x20] sm:$0xff]  }
 0x4ca   :  { %2607 = vmatprep.subr.bf16.mxu0 %v2957_v0 }
 0x4cb   :  { %2602 = vmatpush3.bf16.msra.mxu1 %v2734_v1 }
 0x4cc   :  { %2597 = vmatmul.mubr.msk.f32.vlgmr.msra.gmra.mrb[14].mxu0 %vm141_vm2, %v1190_v53  ;;  %2627 = vmatprep.subr.bf16.mxu1 %v2957_v0  ;;  %v2740_v53 = vld [vmem:[%s3410_s10 + $0x28] sm:$0xff]  }
 0x4cd   :  { %2623 = vmatprep.mubr.msk.bf16.mxu0 %vm2958_vm0, %v2957_v0  ;;  %2608 = vmatpush3.bf16.msra.mxu0 %v2735_v39  ;;  %v2751_v39 = vld [vmem:[#allocation10] sm:$0xff]  }
 0x4ce   :  { %2609 = vmatprep.subr.bf16.mxu0 %v2957_v0 }
 0x4d1   :  { %2610 = vmatpush3.bf16.msra.mxu0 %v2736_v40  ;;  %v2752_v40 = vld [vmem:[#allocation10 + $0x8] sm:$0xff]  }
 0x4d2   :  { %2611 = vmatprep.subr.bf16.mxu0 %v2957_v0 }
 0x4d5   :  { %2612 = vmatpush3.bf16.msra.mxu0 %v2737_v50  ;;  %v2753_v50 = vld [vmem:[#allocation10 + $0x10] sm:$0xff]  }
 0x4d6   :  { %2613 = vmatprep.subr.bf16.mxu0 %v2957_v0 }
 0x4d9   :  { %2614 = vmatpush3.bf16.msra.mxu0 %v2738_v51  ;;  %v2754_v51 = vld [vmem:[#allocation10 + $0x18] sm:$0xff]  }
 0x4da   :  { %2615 = vmatprep.subr.bf16.mxu0 %v2957_v0 }
 0x4dd   :  { %2616 = vmatpush3.bf16.msra.mxu0 %v2739_v52  ;;  %v2755_v52 = vld [vmem:[#allocation10 + $0x20] sm:$0xff]  }
 0x4de   :  { %2617 = vmatprep.subr.bf16.mxu0 %v2957_v0 }
 0x4e1   :  { %2618 = vmatpush3.bf16.msra.mxu0 %v2740_v53  ;;  %v2756_v53 = vld [vmem:[#allocation10 + $0x28] sm:$0xff]  }
 0x4e2   :  { %2619 = vmatprep.subr.bf16.mxu0 %v2957_v0 }
 0x52f   :  { %v1333_v54 = vpop.f32.mrb[8].mxu0 }
 0x530   :  { %v2568_v55 = vpop.f32.mrb[9].mxu0 }
 0x531   :  { %v2742_v55 = vld [vmem:[%s3410_s10 + $0x38] sm:$0xff]  }
 0x536   :  { %v1260_v56 = vpop.f32.mrb[20].mxu1 }
 0x537   :  { %v2563_v57 = vpop.f32.mrb[21].mxu1 }
 0x538   :  { %v2744_v57 = vld [vmem:[#allocation9 + $0x8] sm:$0xff]  }
 0x589   :  { %v1406_v58 = vpop.f32.mrb[22].mxu1 }
 0x58a   :  { %v2573_v59 = vpop.f32.mrb[23].mxu1 }
 0x58b   :  { %v2746_v59 = vld [vmem:[#allocation9 + $0x18] sm:$0xff]  }
 0x594   :  { %v1552_v61 = vpop.f32.mrb[24].mxu1 }
 0x595   :  { %v2583_v62 = vpop.f32.mrb[25].mxu1 }
 0x597   :  { %v1479_v63 = vpop.f32.mrb[10].mxu0 }
 0x598   :  { %v2686_v2 = vpack.i.bf16 %v1479_v63, %v1406_v58  ;;  %v1698_v3 = vpop.f32.mrb[26].mxu1  ;;  %v2578_v4 = vpop.f32.mrb[11].mxu0  ;;  %v2745_v58 = vld [vmem:[#allocation9 + $0x10] sm:$0xff]  }
 0x599   :  { %v2593_v5 = vpop.f32.mrb[27].mxu1 }
 0x59a   :  { %2687 = vrot.lane.b32.xlu0 %v2686_v2, %s2963_s22 }
 0x59b   :  { %v1625_v6 = vpop.f32.mrb[12].mxu0 }
 0x59c   :  { %v2691_v7 = vpack.i.bf16 %v1625_v6, %v1552_v61  ;;  %v2588_v10 = vpop.f32.mrb[13].mxu0  ;;  %v2748_v61 = vld [vmem:[#allocation9 + $0x28] sm:$0xff]   ;;  %v2387_v6 = vld [vmem:[#allocation6] ss:$0 sm:$0xff] }
 0x59e   :  { %2692 = vrot.lane.b32.xlu1 %v2691_v7, %s2964_s2 }
 0x59f   :  { %v1771_v11 = vpop.f32.mrb[14].mxu0 }
 0x5a0   :  { %v2696_v12 = vpack.i.bf16 %v1771_v11, %v1698_v3  ;;  %v2598_v13 = vpop.f32.mrb[15].mxu0 }
 0x5a1   :  { %v2388_v13 = vld [vmem:[#allocation7] ss:$0 sm:$0xff] }
 0x5a2   :  { %2697 = vrot.lane.b32.xlu0 %v2696_v12, %s2965_s12 }
 0x60c   :  { %v2688_v14 = vpop.permute.xlu0 %2687 }
 0x60d   :  { %v2690_v16 = vunpack.i.h.bf16 %v2688_v14  ;;  %v2689_v17 = vunpack.i.l.bf16 %v2688_v14 }
 0x60f   :  { %v1800_v21 = vsel %vm141_vm2, %v1333_v54, %v2690_v16  ;;  %v1799_v22 = vsel %vm141_vm2, %v1260_v56, %v2689_v17  ;;  %v2741_v54 = vld [vmem:[%s3410_s10 + $0x30] sm:$0xff]  }
 0x610   :  { %v2693_v15 = vpop.permute.xlu1 %2692  ;;  %2620 = vmatpush3.bf16.msra.mxu0 %v2741_v54  ;;  %v2743_v56 = vld [vmem:[#allocation9] sm:$0xff]   ;;  %v2758_v54 = vld [vmem:[#allocation10 + $0x38] sm:$0xff]  }
 0x611   :  { %v2695_v18 = vunpack.i.h.bf16 %v2693_v15  ;;  %v2694_v19 = vunpack.i.l.bf16 %v2693_v15  ;;  %2621 = vmatprep.subr.bf16.mxu0 %v2957_v0 }
 0x613   :  { %v1803_v25 = vsel %vm1801_vm3, %v1800_v21, %v2695_v18  ;;  %v1802_v26 = vsel %vm1801_vm3, %v1799_v22, %v2694_v19  ;;  %v2749_v18 = vld [vmem:[#allocation9 + $0x30] sm:$0xff]   ;;  %v2750_v19 = vld [vmem:[#allocation9 + $0x38] sm:$0xff]  }
 0x614   :  { %v2698_v20 = vpop.permute.xlu0 %2697  ;;  %2622 = vmatpush3.bf16.msra.mxu0 %v2742_v55 }
 0x615   :  { %v2700_v23 = vunpack.i.h.bf16 %v2698_v20  ;;  %v2699_v24 = vunpack.i.l.bf16 %v2698_v20  ;;  %2647 = vmatprep.subr.bf16.mxu0 %v2957_v0  ;;  %v2389_v20 = vld [vmem:[%s3411_s11] ss:$0 sm:$0xff] }
 0x617   :  { %v1806_v27 = vsel %vm1804_vm4, %v1803_v25, %v2700_v23  ;;  %v1805_v28 = vsel %vm1804_vm4, %v1802_v26, %v2699_v24 }
 0x618   :  { %v1807_v29 = vpack.c.bf16 %v1806_v27, %v1805_v28 }
 0x61a   :  { %2604 = vmatmul.mubr.msk.bf16.vlgmr.msra.gmra.mrb[28].mxu1 %vm1831_vm5, %v1807_v29 }
 0x61b   :  { %2643 = vmatprep.mubr.msk.bf16.mxu1 %vm2958_vm0, %v2957_v0  ;;  %2628 = vmatpush3.bf16.msra.mxu1 %v2743_v56 }
 0x61c   :  { %2629 = vmatprep.subr.bf16.mxu1 %v2957_v0 }
 0x61f   :  { %2630 = vmatpush3.bf16.msra.mxu1 %v2744_v57 }
 0x620   :  { %2631 = vmatprep.subr.bf16.mxu1 %v2957_v0 }
 0x623   :  { %2632 = vmatpush3.bf16.msra.mxu1 %v2745_v58 }
 0x624   :  { %2633 = vmatprep.subr.bf16.mxu1 %v2957_v0 }
 0x627   :  { %2634 = vmatpush3.bf16.msra.mxu1 %v2746_v59 }
 0x628   :  { %2635 = vmatprep.subr.bf16.mxu1 %v2957_v0 }
 0x62b   :  { %2636 = vmatpush3.bf16.msra.mxu1 %v2747_v60 }
 0x62c   :  { %2637 = vmatprep.subr.bf16.mxu1 %v2957_v0 }
 0x62f   :  { %2638 = vmatpush3.bf16.msra.mxu1 %v2748_v61 }
 0x630   :  { %2639 = vmatprep.subr.bf16.mxu1 %v2957_v0 }
 0x633   :  { %2640 = vmatpush3.bf16.msra.mxu1 %v2749_v18 }
 0x634   :  { %2641 = vmatprep.subr.bf16.mxu1 %v2957_v0 }
 0x637   :  { %2642 = vmatpush3.bf16.msra.mxu1 %v2750_v19 }
 0x6ed   :  { %v1869_v31 = vpop.f32.mrb[28].mxu1 }
 0x6ee   :  { %v1870_v9 = vadd.f32 %v2382_v30, %v1869_v31  ;;  %v2605_v8 = vpop.f32.mrb[29].mxu1 }
 0x6ef   :  { %v1872_v32 = vpop.f32.mrb[30].mxu1 }
 0x6f0   :  { %v1873_v33 = vadd.f32 %v2382_v30, %v1872_v32  ;;  %v2606_v34 = vpop.f32.mrb[31].mxu1  ;;  %v1876_v37 = vadd.f32 %v1870_v9, %v3161_v35  ;;  %v2398_v30 = vld [vmem:[%s3413_s13] ss:$0 sm:$0xff] }
 0x6f2   :  { %1880 = vadd.xlane.f32.xlu1 %v1876_v37  ;;  %v1877_v38 = vadd.f32 %v1873_v33, %v3163_v36  ;;  %v3333_v36 = vld [vmem:[%s3425_s27] ss:$0 sm:$0xff] }
 0x6f4   :  { %1882 = vadd.xlane.f32.xlu0 %v1877_v38 }
 0x77f   :  { %v1881_v41 = vpop.xlane.xlu1 %1880 }
 0x780   :  { %v1884_v35 = vmul.f32 0.03125, %v1881_v41 }
 0x781   :  { %v1883_v42 = vpop.xlane.xlu0 %1882 }
 0x782   :  { %v1886_v43 = vsub.f32 %v1876_v37, %v1884_v35  ;;  %v1885_v44 = vmul.f32 0.03125, %v1883_v42 }
 0x784   :  { %v1887_v45 = vsub.f32 %v1877_v38, %v1885_v44  ;;  %v1894_v46 = vmul.f32 %v3333_v36, %v1886_v43 }
 0x786   :  { %v1896_v47 = vmul.f32 %v1894_v46, %v1894_v46  ;;  %v1895_v48 = vmul.f32 %v3333_v36, %v1887_v45 }
 0x788   :  { %1898 = vadd.xlane.f32.xlu0 %v1896_v47  ;;  %v1897_v49 = vmul.f32 %v1895_v48, %v1895_v48 }
 0x78a   :  { %1900 = vadd.xlane.f32.xlu1 %v1897_v49 }
 0x815   :  { %v1899_v62 = vpop.xlane.xlu0 %1898 }
 0x816   :  { %v1902_v63 = vmul.f32 0.03125, %v1899_v62  ;;  %v2407_v62 = vld [vmem:[%s3414_s14] ss:$0 sm:$0xff] }
 0x817   :  { %v1901_v1 = vpop.xlane.xlu1 %1900 }
 0x818   :  { %v1904_v2 = vadd.f32 1e-05, %v1902_v63  ;;  %v1903_v3 = vmul.f32 0.03125, %v1901_v1 }
 0x81a   :  { %2791 = vrsqrt.f32 %v1904_v2  ;;  %v1905_v4 = vadd.f32 1e-05, %v1903_v3 }
 0x81c   :  { %2793 = vrsqrt.f32 %v1905_v4 }
 0x824   :  { %v2792_v5 = vpop.eup %2791 }
 0x825   :  { %v1908_v7 = vmul.f32 %v2792_v5, %v1894_v46 }
 0x826   :  { %v2794_v10 = vpop.eup %2793 }
 0x827   :  { %v1909_v11 = vmul.f32 %v2794_v10, %v1895_v48  ;;  %v1916_v12 = vmul.f32 %v2387_v6, %v1908_v7  ;;  %v2409_v10 = vld [vmem:[%s3417_s17] ss:$0 sm:$0xff] }
 0x829   :  { %v1917_v14 = vmul.f32 %v2387_v6, %v1909_v11  ;;  %v1924_v15 = vadd.f32 %v2388_v13, %v1916_v12 }
 0x82b   :  { %v1925_v16 = vadd.f32 %v2388_v13, %v1917_v14 }
 0x82d   :  { %v1926_v17 = vpack.c.bf16 %v1925_v16, %v1924_v15 }
 0x82f   :  { %2624 = vmatmul.mubr.bf16.vlgmr.msra.gmra.mrb[16].mxu0 %v1926_v17 }
 0x830   :  { %2663 = vmatprep.mubr.msk.bf16.mxu0 %vm2958_vm0, %v2957_v0  ;;  %2648 = vmatpush3.bf16.msra.mxu0 %v2751_v39 }
 0x831   :  { %2649 = vmatprep.subr.bf16.mxu0 %v2957_v0 }
 0x834   :  { %2650 = vmatpush3.bf16.msra.mxu0 %v2752_v40 }
 0x835   :  { %2651 = vmatprep.subr.bf16.mxu0 %v2957_v0 }
 0x838   :  { %2652 = vmatpush3.bf16.msra.mxu0 %v2753_v50 }
 0x839   :  { %2653 = vmatprep.subr.bf16.mxu0 %v2957_v0 }
 0x83c   :  { %2654 = vmatpush3.bf16.msra.mxu0 %v2754_v51 }
 0x83d   :  { %2655 = vmatprep.subr.bf16.mxu0 %v2957_v0 }
 0x840   :  { %2656 = vmatpush3.bf16.msra.mxu0 %v2755_v52 }
 0x841   :  { %2657 = vmatprep.subr.bf16.mxu0 %v2957_v0 }
 0x844   :  { %2658 = vmatpush3.bf16.msra.mxu0 %v2756_v53 }
 0x845   :  { %2659 = vmatprep.subr.bf16.mxu0 %v2957_v0 }
 0x902   :  { %v2032_v21 = vpop.f32.mrb[16].mxu0 }
 0x903   :  { %v2033_v22 = vadd.f32 %v2389_v20, %v2032_v21  ;;  %v2625_v23 = vpop.f32.mrb[17].mxu0 }
 0x904   :  { %v2035_v24 = vpop.f32.mrb[18].mxu0 }
 0x905   :  { %v2036_v25 = vadd.f32 %v2389_v20, %v2035_v24  ;;  %v2626_v26 = vpop.f32.mrb[19].mxu0  ;;  %v2039_v27 = vmax.f32 %v2033_v22, 0.0 }
 0x907   :  { %v2040_v28 = vmax.f32 %v2036_v25, 0.0 }
 0x909   :  { %v2041_v29 = vpack.c.bf16 %v2040_v28, %v2039_v27 }
 0x90b   :  { %2644 = vmatmul.mubr.bf16.vlgmr.msra.gmra.mrb[32].mxu1 %v2041_v29 }
 0x9de   :  { %v2147_v31 = vpop.f32.mrb[32].mxu1 }
 0x9df   :  { %v2148_v9 = vadd.f32 %v2398_v30, %v2147_v31  ;;  %v2645_v8 = vpop.f32.mrb[33].mxu1 }
 0x9e0   :  { %v2150_v32 = vpop.f32.mrb[34].mxu1 }
 0x9e1   :  { %v2151_v33 = vadd.f32 %v2398_v30, %v2150_v32  ;;  %v2646_v34 = vpop.f32.mrb[35].mxu1  ;;  %v2154_v37 = vadd.f32 %v2148_v9, %v1924_v15 }
 0x9e3   :  { %2158 = vadd.xlane.f32.xlu0 %v2154_v37  ;;  %v2155_v38 = vadd.f32 %v2151_v33, %v1925_v16 }
 0x9e5   :  { %2160 = vadd.xlane.f32.xlu1 %v2155_v38 }
 0xa70   :  { %v2159_v41 = vpop.xlane.xlu0 %2158 }
 0xa71   :  { %v2162_v35 = vmul.f32 0.03125, %v2159_v41 }
 0xa72   :  { %v2161_v42 = vpop.xlane.xlu1 %2160 }
 0xa73   :  { %v2164_v43 = vsub.f32 %v2154_v37, %v2162_v35  ;;  %v2163_v44 = vmul.f32 0.03125, %v2161_v42 }
 0xa75   :  { %v2165_v45 = vsub.f32 %v2155_v38, %v2163_v44  ;;  %v2166_v46 = vmul.f32 %v3333_v36, %v2164_v43 }
 0xa77   :  { %v2168_v47 = vmul.f32 %v2166_v46, %v2166_v46  ;;  %v2167_v48 = vmul.f32 %v3333_v36, %v2165_v45  ;;  %v2757_v36 = vld [vmem:[#allocation10 + $0x30] sm:$0xff]  }
 0xa78   :  { %2660 = vmatpush3.bf16.msra.mxu0 %v2757_v36 }
 0xa79   :  { %2170 = vadd.xlane.f32.xlu0 %v2168_v47  ;;  %v2169_v49 = vmul.f32 %v2167_v48, %v2167_v48  ;;  %2661 = vmatprep.subr.bf16.mxu0 %v2957_v0  ;;  %v2408_v0 = vld [vmem:[%s3415_s15] ss:$0 sm:$0xff] }
 0xa7b   :  { %2172 = vadd.xlane.f32.xlu1 %v2169_v49 }
 0xa7c   :  { %2662 = vmatpush3.bf16.msra.mxu0 %v2758_v54 }
 0xb06   :  { %v2171_v55 = vpop.xlane.xlu0 %2170 }
 0xb07   :  { %v2174_v56 = vmul.f32 0.03125, %v2171_v55 }
 0xb08   :  { %v2173_v57 = vpop.xlane.xlu1 %2172 }
 0xb09   :  { %v2176_v58 = vadd.f32 1e-05, %v2174_v56  ;;  %v2175_v59 = vmul.f32 0.03125, %v2173_v57 }
 0xb0b   :  { %2795 = vrsqrt.f32 %v2176_v58  ;;  %v2177_v60 = vadd.f32 1e-05, %v2175_v59 }
 0xb0d   :  { %2797 = vrsqrt.f32 %v2177_v60 }
 0xb15   :  { %v2796_v61 = vpop.eup %2795 }
 0xb16   :  { %v2180_v63 = vmul.f32 %v2796_v61, %v2166_v46 }
 0xb17   :  { %v2798_v1 = vpop.eup %2797 }
 0xb18   :  { %v2181_v2 = vmul.f32 %v2798_v1, %v2167_v48  ;;  %v2188_v3 = vmul.f32 %v2407_v62, %v2180_v63 }
 0xb1a   :  { %v2189_v4 = vmul.f32 %v2407_v62, %v2181_v2  ;;  %v2196_v5 = vadd.f32 %v2408_v0, %v2188_v3 }
 0xb1c   :  { %v2197_v6 = vadd.f32 %v2408_v0, %v2189_v4 }
 0xb1e   :  { %v2198_v7 = vpack.c.bf16 %v2197_v6, %v2196_v5 }
 0xb20   :  { %2664 = vmatmul.mubr.bf16.vlgmr.msra.gmra.mrb[20].mxu0 %v2198_v7 }
 0xbf3   :  { %v2304_v11 = vpop.f32.mrb[20].mxu0 }
 0xbf4   :  { %v2305_v12 = vadd.f32 %v2409_v10, %v2304_v11  ;;  %v2665_v13 = vpop.f32.mrb[21].mxu0 }
 0xbf5   :  { %v2307_v14 = vpop.f32.mrb[22].mxu0 }
 0xbf6   :  { %v2418_v15 = vmul.f32 -1.442695, %v2305_v12  ;;  %v2308_v16 = vadd.f32 %v2409_v10, %v2307_v14  ;;  %v2666_v17 = vpop.f32.mrb[23].mxu0 }
 0xbf8   :  { %2799 = vpow2.f32 %v2418_v15  ;;  %v2419_v18 = vmul.f32 -1.442695, %v2308_v16 }
 0xbfa   :  { %2801 = vpow2.f32 %v2419_v18 }
 0xc02   :  { %v2800_v19 = vpop.eup %2799 }
 0xc03   :  { %v2317_v20 = vadd.f32 1.0, %v2800_v19 }
 0xc04   :  { %v2802_v21 = vpop.eup %2801 }
 0xc05   :  { %2803 = vrcp.f32 %v2317_v20  ;;  %v2318_v22 = vadd.f32 1.0, %v2802_v21 }
 0xc07   :  { %2805 = vrcp.f32 %v2318_v22 }
 0xc0f   :  { %v2804_v23 = vpop.eup %2803 }
 0xc10   :  { %2323 = vst [vmem:[%s3418_s18] sm:$0xff] %v2804_v23 }
 0xc11   :  { %v2806_v24 = vpop.eup %2805 }
 0xc12   :  { %2324 = vst [vmem:[%s3418_s18 + $0x8] sm:$0xff] %v2806_v24 }
 0xc13   :  { %2329 = vsyncpa [#allocation3], 1 }
 0xc14   :  { %2330 = vsyncpa [#allocation5], 1 }
 0xc15   :  { %2331 = vsyncpa [#allocation8], 1 }
 0xc16   :  { %2332 = vsyncpa [#allocation11], 1 }

</bundles_post_ra>
